<compile_context>
chip_gen: v6e
topology: v6e:2x2x1
jax: 0.10.0
libtpu: 0.0.40
codegen_flags: <defaults>
</compile_context>

<pallas_src>
import functools
import math

import jax
import jax.numpy as jnp
from jax.experimental import pallas as pl
from jax.experimental.pallas import tpu as pltpu


def _round_up(a, m):
    return (a + m - 1) // m * m


def _tpu_vmem_bytes():
    """Physical per-core VMEM; conservative v7x fallback if the query is unavailable."""
    try:
        return int(pltpu.get_tpu_info().vmem_capacity_bytes)
    except Exception:
        return 64 * 1024 * 1024


def _const_weight_spec(shape):
    """BlockSpec for a grid-invariant operand: single-buffered (constant index_map)."""
    index_map = lambda b, i: (0,) * len(shape)
    try:
        return pl.BlockSpec(shape, index_map, pipeline_mode=pl.Buffered(1))
    except TypeError:  # older jax without pipeline_mode: fall back to default buffering
        return pl.BlockSpec(shape, index_map)


def cross_attention_kernel(x_ref, k_ref, v_ref, wq_ref, wo_ref, b_ref,
                           out_ref, attn_ref, *, heads, dh_pad, sk_valid,
                           compute_dtype, approx_recip):
    x = x_ref[0]        # (Tq, Dq)            compute dtype
    k_all = k_ref[0]    # (Sk_pad, H*dh_pad)  compute dtype, head-padded / lane-aligned
    v_all = v_ref[0]    # (Sk_pad, H*dh_pad)

    # Wide Q projection: one MXU pass (softmax scale pre-folded into Wq on the host).
    q_all = jnp.dot(x, wq_ref[...],
                    preferred_element_type=jnp.float32).astype(compute_dtype)

    # Mask for padded key columns (static decision: only emitted when Sk was padded).
    sk_pad = k_ref.shape[1]
    if sk_pad != sk_valid:
        col = jax.lax.broadcasted_iota(jnp.int32, (1, sk_pad), 1)
        key_bias = jnp.where(col < sk_valid, 0.0, -1e30).astype(jnp.float32)
    else:
        key_bias = None

    contract_last = (((1,), (1,)), ((), ()))  # contract last dims of q and k: no k.T relayout
    for h in range(heads):                    # static unroll; H is small (<= 8-16 in SD)
        lo = h * dh_pad                       # 128-lane aligned offset
        qh = q_all[:, lo:lo + dh_pad]
        kh = k_all[:, lo:lo + dh_pad]
        vh = v_all[:, lo:lo + dh_pad]

        scores = jax.lax.dot_general(qh, kh, contract_last,
                                     preferred_element_type=jnp.float32)  # (Tq, Sk_pad) f32
        if key_bias is not None:
            scores = scores + key_bias

        # Numerically stable softmax in f32; normalize AFTER the PV matmul so the
        # reciprocal multiply is (Tq, dh_pad) instead of (Tq, Sk_pad).
        m = jnp.max(scores, axis=-1, keepdims=True)
        e = jnp.exp(scores - m)
        denom = jnp.sum(e, axis=-1, keepdims=True)
        pv = jnp.dot(e.astype(compute_dtype), vh,
                     preferred_element_type=jnp.float32)                  # (Tq, dh_pad) f32
        attn = pv * pl.reciprocal(denom, approx=approx_recip)
        attn_ref[:, lo:lo + dh_pad] = attn.astype(compute_dtype)          # lane-aligned store

    # One wide output projection (K = H*dh_pad; padded rows of Wo are zero) + bias.
    out = jnp.dot(attn_ref[...], wo_ref[...], preferred_element_type=jnp.float32)  # (Tq, Dq)
    out_ref[0] = (out + b_ref[...]).astype(out_ref.dtype)


def cross_attention(hidden_states, context, wq, wk, wv, wo, bo, *, heads, dim_head,
                    compute_dtype=jnp.bfloat16, q_block=None, vmem_limit_bytes=None):
    """hidden_states: [B, Sq, Dq]; context: [B, Sk, Dc].

    wq: [Dq, H*dh], wk/wv: [Dc, H*dh], wo: [H*dh, Dq], bo: [Dq]
    (already transposed so y = x @ W, matching PyTorch's x @ weight.T).
    """
    B, Sq, Dq = hidden_states.shape
    _, Sk, Dc = context.shape
    H, dh = heads, dim_head
    scale = dh ** (-0.5)
    out_dtype = hidden_states.dtype
    cd = jnp.dtype(compute_dtype)

    # Generation-aware tiling / VMEM budget (v7x: 64 MiB physical -> ~48 MiB limit, tq<=256;
    # v5e/v6e: 128 MiB -> ~96 MiB limit, tq<=512).
    vmem_cap = _tpu_vmem_bytes()
    if vmem_limit_bytes is None:
        vmem_limit_bytes = (vmem_cap * 3) // 4
    if q_block is None:
        q_block = 512 if vmem_cap >= 100 * 1024 * 1024 else 256

    # Head-padded, 128-lane-aligned layout: each head's dh columns start at h*dh_pad.
    dh_pad = _round_up(dh, 128)
    HDp = H * dh_pad

    def pad_head_cols(w):  # (D, H*dh) -> (D, H*dh_pad), zero-padded per head
        d = w.shape[0]
        w = w.reshape(d, H, dh)
        w = jnp.pad(w, ((0, 0), (0, 0), (0, dh_pad - dh)))
        return w.reshape(d, HDp)

    # Fold the softmax scale into Wq on the host (zero in-kernel VPU cost).
    wq_p = pad_head_cols(wq * scale).astype(cd)
    wo_p = jnp.pad(wo.reshape(H, dh, Dq),
                   ((0, 0), (0, dh_pad - dh), (0, 0))).reshape(HDp, Dq).astype(cd)
    bo2 = bo.reshape(1, Dq).astype(jnp.float32)

    # K/V projections hoisted out of the per-Sq-tile loop: two plain XLA GEMMs per batch.
    ctx_cd = context.astype(cd)
    k_all = jnp.dot(ctx_cd, wk.astype(cd), preferred_element_type=jnp.float32).astype(cd)
    v_all = jnp.dot(ctx_cd, wv.astype(cd), preferred_element_type=jnp.float32).astype(cd)

    # Sk padded to a lane-dense multiple of 128 (padded keys masked in-kernel);
    # per-head columns padded to dh_pad so in-kernel slices stay lane-aligned.
    sk_pad = _round_up(Sk, 128)

    def pad_kv(t):  # (B, Sk, H*dh) -> (B, Sk_pad, H*dh_pad)
        t = t.reshape(B, Sk, H, dh)
        t = jnp.pad(t, ((0, 0), (0, sk_pad - Sk), (0, 0), (0, dh_pad - dh)))
        return t.reshape(B, sk_pad, HDp)

    k_all = pad_kv(k_all)
    v_all = pad_kv(v_all)

    # Sq tiling: sublane-aligned tiles; padded query rows are sliced off on the host.
    x = hidden_states.astype(cd)
    tq = _round_up(min(q_block, _round_up(Sq, 8)), 8)
    sq_pad = _round_up(Sq, tq)
    if sq_pad != Sq:
        x = jnp.pad(x, ((0, 0), (0, sq_pad - Sq), (0, 0)))

    grid = (B, sq_pad // tq)

    kernel = functools.partial(
        cross_attention_kernel,
        heads=H, dh_pad=dh_pad, sk_valid=Sk, compute_dtype=cd,
        approx_recip=(cd != jnp.dtype(jnp.float32)),
    )

    # Advisory cost estimate reflecting what the kernel actually executes
    # (Q projection + attention + output projection; K/V projections are caller-side XLA).
    flops = 2 * B * sq_pad * HDp * (2 * Dq + 2 * sk_pad)
    bytes_accessed = int(
        x.size * x.dtype.itemsize
        + k_all.size * k_all.dtype.itemsize + v_all.size * v_all.dtype.itemsize
        + wq_p.size * wq_p.dtype.itemsize + wo_p.size * wo_p.dtype.itemsize
        + bo2.size * bo2.dtype.itemsize
        + B * sq_pad * Dq * jnp.dtype(out_dtype).itemsize)
    cost = pl.CostEstimate(flops=int(flops),
                           transcendentals=int(B * sq_pad * sk_pad * H),
                           bytes_accessed=bytes_accessed)

    out = pl.pallas_call(
        kernel,
        out_shape=jax.ShapeDtypeStruct((B, sq_pad, Dq), out_dtype),
        grid_spec=pltpu.PrefetchScalarGridSpec(
            num_scalar_prefetch=0,
            grid=grid,
            in_specs=[
                pl.BlockSpec((1, tq, Dq), lambda b, i: (b, i, 0)),       # hidden_states tile
                pl.BlockSpec((1, sk_pad, HDp), lambda b, i: (b, 0, 0)),  # K (per batch)
                pl.BlockSpec((1, sk_pad, HDp), lambda b, i: (b, 0, 0)),  # V (per batch)
                _const_weight_spec((Dq, HDp)),                           # Wq (single-buffered)
                _const_weight_spec((HDp, Dq)),                           # Wout
                _const_weight_spec((1, Dq)),                             # bias
            ],
            out_specs=pl.BlockSpec((1, tq, Dq), lambda b, i: (b, i, 0)),
            scratch_shapes=[pltpu.VMEM((tq, HDp), cd)],                  # per-tile attn slab
        ),
        compiler_params=pltpu.CompilerParams(
            dimension_semantics=("parallel", "parallel"),
            vmem_limit_bytes=int(vmem_limit_bytes),
        ),
        cost_estimate=cost,
    )(x, k_all, v_all, wq_p, wo_p, bo2)

    if sq_pad != Sq:
        out = out[:, :Sq, :]
    return out


def cross_attention_ref(hidden_states, context, wq, wk, wv, wo, bo, *, heads, dim_head):
    """Pure-JAX f32 reference mirroring the PyTorch module."""
    B, Sq, Dq = hidden_states.shape
    H, dh = heads, dim_head
    scale = dim_head ** (-0.5)
    q = hidden_states @ wq
    k = context @ wk
    v = context @ wv

    def to_heads(t):
        b, s, d = t.shape
        return t.reshape(b, s, H, d // H).transpose(0, 2, 1, 3).reshape(b * H, s, d // H)

    q, k, v = to_heads(q), to_heads(k), to_heads(v)
    scores = jnp.einsum("bqd,bkd->bqk", q, k) * scale
    probs = jax.nn.softmax(scores, axis=-1)
    out = jnp.einsum("bqk,bkd->bqd", probs, v)
    out = out.reshape(B, H, Sq, dh).transpose(0, 2, 1, 3).reshape(B, Sq, H * dh)
    return out @ wo + bo


if __name__ == "__main__":
    # Small shapes consistent with the module: query_dim=32, context_dim=24,
    # heads=4, dim_head=8 -> inner_dim=32, batch=2, query seq=8, context seq=16.
    B, Sq, Sk = 2, 8, 16
    query_dim, context_dim = 32, 24
    heads, dim_head = 4, 8
    inner_dim = heads * dim_head

    key = jax.random.PRNGKey(0)
    kx, kc, k1, k2, k3, k4, k5 = jax.random.split(key, 7)

    hidden_states = jax.random.normal(kx, (B, Sq, query_dim), dtype=jnp.float32)
    context = jax.random.normal(kc, (B, Sk, context_dim), dtype=jnp.float32)

    def init_w(k, fan_in, fan_out):
        bound = 1.0 / math.sqrt(fan_in)
        return jax.random.uniform(k, (fan_in, fan_out), jnp.float32, -bound, bound)

    wq = init_w(k1, query_dim, inner_dim)     # to_q.weight.T
    wk = init_w(k2, context_dim, inner_dim)   # to_k.weight.T
    wv = init_w(k3, context_dim, inner_dim)   # to_v.weight.T
    wo = init_w(k4, inner_dim, query_dim)     # to_out[0].weight.T
    bo = jax.random.uniform(k5, (query_dim,), jnp.float32,
                            -1.0 / math.sqrt(inner_dim), 1.0 / math.sqrt(inner_dim))

    ref = cross_attention_ref(hidden_states, context, wq, wk, wv, wo, bo,
                              heads=heads, dim_head=dim_head)

    # f32 compute path: tight numerical check against the reference.
    out_f32 = cross_attention(hidden_states, context, wq, wk, wv, wo, bo,
                              heads=heads, dim_head=dim_head,
                              compute_dtype=jnp.float32)
    out_f32 = jax.block_until_ready(out_f32)
    assert out_f32.shape == (B, Sq, query_dim)
    assert jnp.allclose(out_f32, ref, atol=5e-4, rtol=5e-4), "f32 mismatch vs reference"

    # bf16 matmul path (default / production): looser tolerance as expected for bf16.
    out_bf16 = cross_attention(hidden_states, context, wq, wk, wv, wo, bo,
                               heads=heads, dim_head=dim_head,
                               compute_dtype=jnp.bfloat16)
    out_bf16 = jax.block_until_ready(out_bf16)
    assert out_bf16.shape == (B, Sq, query_dim)
    assert jnp.allclose(out_bf16, ref, atol=3e-2, rtol=3e-2), "bf16 mismatch vs reference"

    print("KERNEL_OK")
</pallas_src>

<mosaic_0001>
module attributes {stable_mosaic.version = 11 : i64} {
  func.func @cross_attention_kernel(%arg0: i32, %arg1: i32, %arg2: memref<1x8x32xf32, #tpu.memory_space<vmem>>, %arg3: memref<1x128x512xf32, #tpu.memory_space<vmem>>, %arg4: memref<1x128x512xf32, #tpu.memory_space<vmem>>, %arg5: memref<32x512xf32, #tpu.memory_space<vmem>>, %arg6: memref<512x32xf32, #tpu.memory_space<vmem>>, %arg7: memref<1x32xf32, #tpu.memory_space<vmem>>, %arg8: memref<1x8x32xf32, #tpu.memory_space<vmem>>, %arg9: memref<8x512xf32, #tpu.memory_space<vmem>>) attributes {dimension_semantics = [#tpu.dimension_semantics<parallel>, #tpu.dimension_semantics<parallel>], iteration_bounds = array<i64: 2, 1>, scalar_prefetch = 0 : i64, scratch_operands = 1 : i64, tpu.core_type = #tpu.core_type<tc>, window_params = [{transform_indices = @transform_0, window_bounds = array<i64: 1, 8, 32>}, {transform_indices = @transform_1, window_bounds = array<i64: 1, 128, 512>}, {transform_indices = @transform_2, window_bounds = array<i64: 1, 128, 512>}, {pipeline_mode = #tpu.pipeline_mode<synchronous>, transform_indices = @transform_3, window_bounds = array<i64: 32, 512>}, {pipeline_mode = #tpu.pipeline_mode<synchronous>, transform_indices = @transform_4, window_bounds = array<i64: 512, 32>}, {pipeline_mode = #tpu.pipeline_mode<synchronous>, transform_indices = @transform_5, window_bounds = array<i64: 1, 32>}, {transform_indices = @transform_6, window_bounds = array<i64: 1, 8, 32>}]} {
    %c0 = arith.constant 0 : index
    %c0_0 = arith.constant 0 : index
    %c0_1 = arith.constant 0 : index
    %0 = vector.load %arg2[%c0, %c0_0, %c0_1] : memref<1x8x32xf32, #tpu.memory_space<vmem>>, vector<1x8x32xf32>
    %1 = vector.shape_cast %0 : vector<1x8x32xf32> to vector<8x32xf32>
    %c0_2 = arith.constant 0 : index
    %c0_3 = arith.constant 0 : index
    %c0_4 = arith.constant 0 : index
    %2 = vector.load %arg3[%c0_2, %c0_3, %c0_4] : memref<1x128x512xf32, #tpu.memory_space<vmem>>, vector<1x128x512xf32>
    %3 = vector.shape_cast %2 : vector<1x128x512xf32> to vector<128x512xf32>
    %c0_5 = arith.constant 0 : index
    %c0_6 = arith.constant 0 : index
    %c0_7 = arith.constant 0 : index
    %4 = vector.load %arg4[%c0_5, %c0_6, %c0_7] : memref<1x128x512xf32, #tpu.memory_space<vmem>>, vector<1x128x512xf32>
    %5 = vector.shape_cast %4 : vector<1x128x512xf32> to vector<128x512xf32>
    %c0_8 = arith.constant 0 : index
    %c0_9 = arith.constant 0 : index
    %6 = vector.load %arg5[%c0_8, %c0_9] : memref<32x512xf32, #tpu.memory_space<vmem>>, vector<32x512xf32>
    %cst = arith.constant dense<0.000000e+00> : vector<8x512xf32>
    %7 = tpu.matmul %1, %6, %cst {dimension_numbers = #tpu.dot_dimension_numbers<[1], [0], [0], [1], [0, 0, 1, 1], [], []>} : vector<8x32xf32>, vector<32x512xf32>, vector<8x512xf32> -> vector<8x512xf32>
    %8 = tpu.iota {dimensions = array<i32: 1>} : vector<1x128xi32>
    %c16_i32 = arith.constant 16 : i32
    %9 = vector.broadcast %c16_i32 : i32 to vector<1x128xi32>
    %10 = arith.cmpi slt, %8, %9 : vector<1x128xi32>
    %cst_10 = arith.constant 0.000000e+00 : f32
    %cst_11 = arith.constant -1.000000e+30 : f32
    %11 = vector.broadcast %cst_10 : f32 to vector<1x128xf32>
    %12 = vector.broadcast %cst_11 : f32 to vector<1x128xf32>
    %13 = arith.select %10, %11, %12 : vector<1x128xi1>, vector<1x128xf32>
    %14 = vector.extract_strided_slice %7 {offsets = [0, 0], sizes = [8, 128], strides = [1, 1]} : vector<8x512xf32> to vector<8x128xf32>
    %15 = vector.extract_strided_slice %3 {offsets = [0, 0], sizes = [128, 128], strides = [1, 1]} : vector<128x512xf32> to vector<128x128xf32>
    %16 = vector.extract_strided_slice %5 {offsets = [0, 0], sizes = [128, 128], strides = [1, 1]} : vector<128x512xf32> to vector<128x128xf32>
    %cst_12 = arith.constant dense<0.000000e+00> : vector<8x128xf32>
    %17 = tpu.matmul %14, %15, %cst_12 {dimension_numbers = #tpu.dot_dimension_numbers<[1], [1], [0], [0], [0, 0, 1, 0], [], []>} : vector<8x128xf32>, vector<128x128xf32>, vector<8x128xf32> -> vector<8x128xf32>
    %18 = vector.broadcast %13 : vector<1x128xf32> to vector<8x128xf32>
    %19 = arith.addf %17, %18 : vector<8x128xf32>
    %cst_13 = arith.constant dense<0xFF800000> : vector<8xf32>
    %20 = vector.multi_reduction <maximumf>, %19, %cst_13 [1] : vector<8x128xf32> to vector<8xf32>
    %21 = vector.shape_cast %20 : vector<8xf32> to vector<8x1xf32>
    %22 = vector.broadcast %21 : vector<8x1xf32> to vector<8x128xf32>
    %23 = arith.subf %19, %22 : vector<8x128xf32>
    %24 = math.exp %23 : vector<8x128xf32>
    %cst_14 = arith.constant dense<0.000000e+00> : vector<8xf32>
    %25 = vector.multi_reduction <add>, %24, %cst_14 [1] : vector<8x128xf32> to vector<8xf32>
    %26 = vector.shape_cast %25 : vector<8xf32> to vector<8x1xf32>
    %cst_15 = arith.constant dense<0.000000e+00> : vector<8x128xf32>
    %27 = tpu.matmul %24, %16, %cst_15 {dimension_numbers = #tpu.dot_dimension_numbers<[1], [0], [0], [1], [0, 0, 1, 1], [], []>} : vector<8x128xf32>, vector<128x128xf32>, vector<8x128xf32> -> vector<8x128xf32>
    %28 = tpu.reciprocal %26 : vector<8x1xf32> -> vector<8x1xf32>
    %29 = vector.broadcast %28 : vector<8x1xf32> to vector<8x128xf32>
    %30 = arith.mulf %27, %29 : vector<8x128xf32>
    %c0_16 = arith.constant 0 : index
    %c0_17 = arith.constant 0 : index
    %31 = vector.load %arg9[%c0_16, %c0_17] : memref<8x512xf32, #tpu.memory_space<vmem>>, vector<8x128xf32>
    tpu.vector_store %arg9[%c0_16, %c0_17], %30 {strides = array<i32>} : memref<8x512xf32, #tpu.memory_space<vmem>>, vector<8x128xf32>,
    %32 = vector.extract_strided_slice %7 {offsets = [0, 128], sizes = [8, 128], strides = [1, 1]} : vector<8x512xf32> to vector<8x128xf32>
    %33 = vector.extract_strided_slice %3 {offsets = [0, 128], sizes = [128, 128], strides = [1, 1]} : vector<128x512xf32> to vector<128x128xf32>
    %34 = vector.extract_strided_slice %5 {offsets = [0, 128], sizes = [128, 128], strides = [1, 1]} : vector<128x512xf32> to vector<128x128xf32>
    %cst_18 = arith.constant dense<0.000000e+00> : vector<8x128xf32>
    %35 = tpu.matmul %32, %33, %cst_18 {dimension_numbers = #tpu.dot_dimension_numbers<[1], [1], [0], [0], [0, 0, 1, 0], [], []>} : vector<8x128xf32>, vector<128x128xf32>, vector<8x128xf32> -> vector<8x128xf32>
    %36 = vector.broadcast %13 : vector<1x128xf32> to vector<8x128xf32>
    %37 = arith.addf %35, %36 : vector<8x128xf32>
    %cst_19 = arith.constant dense<0xFF800000> : vector<8xf32>
    %38 = vector.multi_reduction <maximumf>, %37, %cst_19 [1] : vector<8x128xf32> to vector<8xf32>
    %39 = vector.shape_cast %38 : vector<8xf32> to vector<8x1xf32>
    %40 = vector.broadcast %39 : vector<8x1xf32> to vector<8x128xf32>
    %41 = arith.subf %37, %40 : vector<8x128xf32>
    %42 = math.exp %41 : vector<8x128xf32>
    %cst_20 = arith.constant dense<0.000000e+00> : vector<8xf32>
    %43 = vector.multi_reduction <add>, %42, %cst_20 [1] : vector<8x128xf32> to vector<8xf32>
    %44 = vector.shape_cast %43 : vector<8xf32> to vector<8x1xf32>
    %cst_21 = arith.constant dense<0.000000e+00> : vector<8x128xf32>
    %45 = tpu.matmul %42, %34, %cst_21 {dimension_numbers = #tpu.dot_dimension_numbers<[1], [0], [0], [1], [0, 0, 1, 1], [], []>} : vector<8x128xf32>, vector<128x128xf32>, vector<8x128xf32> -> vector<8x128xf32>
    %46 = tpu.reciprocal %44 : vector<8x1xf32> -> vector<8x1xf32>
    %47 = vector.broadcast %46 : vector<8x1xf32> to vector<8x128xf32>
    %48 = arith.mulf %45, %47 : vector<8x128xf32>
    %c0_22 = arith.constant 0 : index
    %c128 = arith.constant 128 : index
    %49 = vector.load %arg9[%c0_22, %c128] : memref<8x512xf32, #tpu.memory_space<vmem>>, vector<8x128xf32>
    tpu.vector_store %arg9[%c0_22, %c128], %48 {strides = array<i32>} : memref<8x512xf32, #tpu.memory_space<vmem>>, vector<8x128xf32>,
    %50 = vector.extract_strided_slice %7 {offsets = [0, 256], sizes = [8, 128], strides = [1, 1]} : vector<8x512xf32> to vector<8x128xf32>
    %51 = vector.extract_strided_slice %3 {offsets = [0, 256], sizes = [128, 128], strides = [1, 1]} : vector<128x512xf32> to vector<128x128xf32>
    %52 = vector.extract_strided_slice %5 {offsets = [0, 256], sizes = [128, 128], strides = [1, 1]} : vector<128x512xf32> to vector<128x128xf32>
    %cst_23 = arith.constant dense<0.000000e+00> : vector<8x128xf32>
    %53 = tpu.matmul %50, %51, %cst_23 {dimension_numbers = #tpu.dot_dimension_numbers<[1], [1], [0], [0], [0, 0, 1, 0], [], []>} : vector<8x128xf32>, vector<128x128xf32>, vector<8x128xf32> -> vector<8x128xf32>
    %54 = vector.broadcast %13 : vector<1x128xf32> to vector<8x128xf32>
    %55 = arith.addf %53, %54 : vector<8x128xf32>
    %cst_24 = arith.constant dense<0xFF800000> : vector<8xf32>
    %56 = vector.multi_reduction <maximumf>, %55, %cst_24 [1] : vector<8x128xf32> to vector<8xf32>
    %57 = vector.shape_cast %56 : vector<8xf32> to vector<8x1xf32>
    %58 = vector.broadcast %57 : vector<8x1xf32> to vector<8x128xf32>
    %59 = arith.subf %55, %58 : vector<8x128xf32>
    %60 = math.exp %59 : vector<8x128xf32>
    %cst_25 = arith.constant dense<0.000000e+00> : vector<8xf32>
    %61 = vector.multi_reduction <add>, %60, %cst_25 [1] : vector<8x128xf32> to vector<8xf32>
    %62 = vector.shape_cast %61 : vector<8xf32> to vector<8x1xf32>
    %cst_26 = arith.constant dense<0.000000e+00> : vector<8x128xf32>
    %63 = tpu.matmul %60, %52, %cst_26 {dimension_numbers = #tpu.dot_dimension_numbers<[1], [0], [0], [1], [0, 0, 1, 1], [], []>} : vector<8x128xf32>, vector<128x128xf32>, vector<8x128xf32> -> vector<8x128xf32>
    %64 = tpu.reciprocal %62 : vector<8x1xf32> -> vector<8x1xf32>
    %65 = vector.broadcast %64 : vector<8x1xf32> to vector<8x128xf32>
    %66 = arith.mulf %63, %65 : vector<8x128xf32>
    %c0_27 = arith.constant 0 : index
    %c256 = arith.constant 256 : index
    %67 = vector.load %arg9[%c0_27, %c256] : memref<8x512xf32, #tpu.memory_space<vmem>>, vector<8x128xf32>
    tpu.vector_store %arg9[%c0_27, %c256], %66 {strides = array<i32>} : memref<8x512xf32, #tpu.memory_space<vmem>>, vector<8x128xf32>,
    %68 = vector.extract_strided_slice %7 {offsets = [0, 384], sizes = [8, 128], strides = [1, 1]} : vector<8x512xf32> to vector<8x128xf32>
    %69 = vector.extract_strided_slice %3 {offsets = [0, 384], sizes = [128, 128], strides = [1, 1]} : vector<128x512xf32> to vector<128x128xf32>
    %70 = vector.extract_strided_slice %5 {offsets = [0, 384], sizes = [128, 128], strides = [1, 1]} : vector<128x512xf32> to vector<128x128xf32>
    %cst_28 = arith.constant dense<0.000000e+00> : vector<8x128xf32>
    %71 = tpu.matmul %68, %69, %cst_28 {dimension_numbers = #tpu.dot_dimension_numbers<[1], [1], [0], [0], [0, 0, 1, 0], [], []>} : vector<8x128xf32>, vector<128x128xf32>, vector<8x128xf32> -> vector<8x128xf32>
    %72 = vector.broadcast %13 : vector<1x128xf32> to vector<8x128xf32>
    %73 = arith.addf %71, %72 : vector<8x128xf32>
    %cst_29 = arith.constant dense<0xFF800000> : vector<8xf32>
    %74 = vector.multi_reduction <maximumf>, %73, %cst_29 [1] : vector<8x128xf32> to vector<8xf32>
    %75 = vector.shape_cast %74 : vector<8xf32> to vector<8x1xf32>
    %76 = vector.broadcast %75 : vector<8x1xf32> to vector<8x128xf32>
    %77 = arith.subf %73, %76 : vector<8x128xf32>
    %78 = math.exp %77 : vector<8x128xf32>
    %cst_30 = arith.constant dense<0.000000e+00> : vector<8xf32>
    %79 = vector.multi_reduction <add>, %78, %cst_30 [1] : vector<8x128xf32> to vector<8xf32>
    %80 = vector.shape_cast %79 : vector<8xf32> to vector<8x1xf32>
    %cst_31 = arith.constant dense<0.000000e+00> : vector<8x128xf32>
    %81 = tpu.matmul %78, %70, %cst_31 {dimension_numbers = #tpu.dot_dimension_numbers<[1], [0], [0], [1], [0, 0, 1, 1], [], []>} : vector<8x128xf32>, vector<128x128xf32>, vector<8x128xf32> -> vector<8x128xf32>
    %82 = tpu.reciprocal %80 : vector<8x1xf32> -> vector<8x1xf32>
    %83 = vector.broadcast %82 : vector<8x1xf32> to vector<8x128xf32>
    %84 = arith.mulf %81, %83 : vector<8x128xf32>
    %c0_32 = arith.constant 0 : index
    %c384 = arith.constant 384 : index
    %85 = vector.load %arg9[%c0_32, %c384] : memref<8x512xf32, #tpu.memory_space<vmem>>, vector<8x128xf32>
    tpu.vector_store %arg9[%c0_32, %c384], %84 {strides = array<i32>} : memref<8x512xf32, #tpu.memory_space<vmem>>, vector<8x128xf32>,
    %c0_33 = arith.constant 0 : index
    %c0_34 = arith.constant 0 : index
    %86 = vector.load %arg9[%c0_33, %c0_34] : memref<8x512xf32, #tpu.memory_space<vmem>>, vector<8x512xf32>
    %c0_35 = arith.constant 0 : index
    %c0_36 = arith.constant 0 : index
    %87 = vector.load %arg6[%c0_35, %c0_36] : memref<512x32xf32, #tpu.memory_space<vmem>>, vector<512x32xf32>
    %cst_37 = arith.constant dense<0.000000e+00> : vector<8x32xf32>
    %88 = tpu.matmul %86, %87, %cst_37 {dimension_numbers = #tpu.dot_dimension_numbers<[1], [0], [0], [1], [0, 0, 1, 1], [], []>} : vector<8x512xf32>, vector<512x32xf32>, vector<8x32xf32> -> vector<8x32xf32>
    %c0_38 = arith.constant 0 : index
    %c0_39 = arith.constant 0 : index
    %89 = vector.load %arg7[%c0_38, %c0_39] : memref<1x32xf32, #tpu.memory_space<vmem>>, vector<1x32xf32>
    %90 = vector.broadcast %89 : vector<1x32xf32> to vector<8x32xf32>
    %91 = arith.addf %88, %90 : vector<8x32xf32>
    %c0_40 = arith.constant 0 : index
    %c0_41 = arith.constant 0 : index
    %c0_42 = arith.constant 0 : index
    %92 = vector.load %arg8[%c0_40, %c0_41, %c0_42] : memref<1x8x32xf32, #tpu.memory_space<vmem>>, vector<1x8x32xf32>
    %93 = vector.shape_cast %92 : vector<1x8x32xf32> to vector<8x32xf32>
    %94 = vector.shape_cast %91 : vector<8x32xf32> to vector<1x8x32xf32>
    tpu.vector_store %arg8[%c0_40, %c0_41, %c0_42], %94 {strides = array<i32>} : memref<1x8x32xf32, #tpu.memory_space<vmem>>, vector<1x8x32xf32>,
    return
  }
  func.func @transform_0(%arg0: i32, %arg1: i32) -> (i32, i32, i32) {
    %c0_i32 = arith.constant 0 : i32
    %c0_i32_0 = arith.constant 0 : i32
    return %arg0, %arg1, %c0_i32 : i32, i32, i32
  }
  func.func @transform_1(%arg0: i32, %arg1: i32) -> (i32, i32, i32) {
    %c0_i32 = arith.constant 0 : i32
    %c0_i32_0 = arith.constant 0 : i32
    %c0_i32_1 = arith.constant 0 : i32
    return %arg0, %c0_i32, %c0_i32_0 : i32, i32, i32
  }
  func.func @transform_2(%arg0: i32, %arg1: i32) -> (i32, i32, i32) {
    %c0_i32 = arith.constant 0 : i32
    %c0_i32_0 = arith.constant 0 : i32
    %c0_i32_1 = arith.constant 0 : i32
    return %arg0, %c0_i32, %c0_i32_0 : i32, i32, i32
  }
  func.func @transform_3(%arg0: i32, %arg1: i32) -> (i32, i32) {
    %c0_i32 = arith.constant 0 : i32
    %c0_i32_0 = arith.constant 0 : i32
    %c0_i32_1 = arith.constant 0 : i32
    return %c0_i32, %c0_i32_0 : i32, i32
  }
  func.func @transform_4(%arg0: i32, %arg1: i32) -> (i32, i32) {
    %c0_i32 = arith.constant 0 : i32
    %c0_i32_0 = arith.constant 0 : i32
    %c0_i32_1 = arith.constant 0 : i32
    return %c0_i32, %c0_i32_0 : i32, i32
  }
  func.func @transform_5(%arg0: i32, %arg1: i32) -> (i32, i32) {
    %c0_i32 = arith.constant 0 : i32
    %c0_i32_0 = arith.constant 0 : i32
    %c0_i32_1 = arith.constant 0 : i32
    return %c0_i32, %c0_i32_0 : i32, i32
  }
  func.func @transform_6(%arg0: i32, %arg1: i32) -> (i32, i32, i32) {
    %c0_i32 = arith.constant 0 : i32
    %c0_i32_0 = arith.constant 0 : i32
    return %arg0, %arg1, %c0_i32 : i32, i32, i32
  }
}

</mosaic_0001>

<bundles_post_ra>
// kernel: tpu_custom_call.1
= control target key start
LH: loop header
LB: loop body
LE: loop exit
PB: predicated region body
PF: predicated region fallthrough
CT: control target
= control target key end

     0   :  { %s3111_s0 = inlined_call_operand.vmem [shape: f32[2,8,32], index: 0, kind: input, shape index: {}]   ;;  %s3112_s1 = inlined_call_operand.hbm [shape: f32[2,128,512], index: 1, kind: input, shape index: {}]   ;;  %s3113_s2 = inlined_call_operand.hbm [shape: f32[2,128,512], index: 2, kind: input, shape index: {}]   ;;  %s3114_s3 = inlined_call_operand.vmem [shape: f32[32,512], index: 3, kind: input, shape index: {}]   ;;  %s3115_s4 = inlined_call_operand.vmem [shape: f32[512,32], index: 4, kind: input, shape index: {}]   ;;  %s3116_s5 = inlined_call_operand.vmem [shape: f32[1,32], index: 5, kind: input, shape index: {}]   ;;  %s3117_s6 = inlined_call_operand.hbm [shape: f32[2,8,32], index: 6, kind: output, shape index: {}]  }
   0x1   :  { %3121 = sst [smem:[#allocation15_spill]] %s3112_s1 }
   0x2   :  { %11 = vsyncpa [#allocation4], 0 }
   0x3   :  { %13 = vsyncpa [#allocation4 + $0x1], 0 }
   0x4   :  { %14 = vsyncpa [#allocation7], 0 }
   0x5   :  { %16 = vsyncpa [#allocation7 + $0x1], 0 }
   0x6   :  { %17 = vsyncpa [#allocation5], 0 }
   0x7   :  { %19 = vsyncpa [#allocation5 + $0x1], 0  ;;  %s2378_s21 = smov 0   ;;  %s2380_s22 = smov 0  }
   0x8   :  { %s2382_s23 = smov 0   ;;  %s2384_s24 = smov 0  }
   0x9   :  { %s2386_s25 = smov 0   ;;  %s2388_s26 = smov 0  }
   0xa LB: > { %3122 = sst [smem:[#allocation12_spill]] %s2321_s23  ;;  %s1595_s27 = sadd.s32 4294967295, %s2333_s26   ;;  %s2333_s26 = sphi %s2388_s26, %s25_s26   ;;  %s2329_s25 = sphi %s2386_s25, %s3140_s25   ;;  %s2325_s24 = sphi %s2384_s24, %s3139_s24   ;;  %s2321_s23 = sphi %s2382_s23, %s3135_s23   ;;  %s2317_s22 = sphi %s2380_s22, %s3138_s22   ;;  %s2313_s21 = sphi %s2378_s21, %s3137_s21  }
   0xb   : > { %s1596_s28 = sadd.s32 4294967294, %s2333_s26   ;;  %s37_s29 = sadd.s32 1, %s2329_s25 }
   0xc   : > { %s72_s30 = sadd.s32 1, %s2321_s23  ;;  %p39_p0 = scmp.ge.s32.totalorder %s37_s29, 2 }
   0xd   : > { %p79_p1 = scmp.ne.s32.totalorder %s2321_s23, %s2317_s22  ;;  %p80_p2 = scmp.eq.s32.totalorder %s2333_s26, 0 }
   0xe   : > { %p85_p3 = scmp.ne.s32.totalorder %s2317_s22, %s2313_s21  ;;  %s3142_s29 = smov (%p39_p0, %s37_s29), 0 }
   0xf   : > { %3123 = sst [smem:[#allocation13_spill]] %s3142_s29  ;;  %p2419_p4 = por %p80_p2, %p79_p1 }
  0x10   : > { %p86_p5 = scmp.eq.s32.totalorder %s1595_s27, 0  ;;  %s69_s8 = ssub.s32 %s2329_s25, %s3142_s29 }
  0x11   : > { %p200_p6 = scmp.eq.s32.totalorder %s1595_s27, 1  ;;  %p70_p7 = scmp.eq.s32.totalorder %s69_s8, 0 }
  0x12   : > { %p2425_p8 = por %p86_p5, %p85_p3  ;;  %p206_p10 = scmp.eq.s32.totalorder %s1596_s28, 1 }
  0x13   : > { %p2429_p9 = por %p200_p6, %p79_p1  ;;  %p2122_p13 = scmp.lt.s32.totalorder %s2333_s26, 2 }
  0x14   : > { %s2434_s11 = scalar_select %p70_p7, %s2321_s23, %s72_s30  }
  0x15   : > { %p2436_p11 = por %p206_p10, %p85_p3  ;;  %s2443_s13 = sand.u32 1, %s2321_s23  }
  0x16   : > { %3127 = sst [smem:[#allocation14_spill]] %s2434_s11  ;;  %s3118_s14 = sshll.u32 %s2443_s13, 9 }
  0x17   : > { %s1617_s15 = sshll.u32 %s2329_s25, 13  ;;  %s3129_s1 = sld [smem:[#allocation15_spill]] }
  0x18   : > { %s249_s19 = scalar_lea.vmem [#allocation3], %s3118_s14  ;;  %p2456_p0 = pnand %p2122_p13, %p2419_p4 }
  0x19   : > { %s256_s20 = sshll.u32 %s249_s19, 4  ;;  %p1605_p1 = scmp.ge.s32.totalorder %s2333_s26, 1  ;;  %s257_s20 = int_to_ptr.vmem [resolvable:$true] %s256_s20 }
  0x1a   : > { %s246_s28 = scalar_lea.sflag [#allocation4], %s2443_s13  ;;  %p2195_p2 = pneg %p2456_p0 }
  0x1b   : > { %s2206_s30 = scalar_lea.vmem %s257_s20, 8192  ;;  %s2335_s8 = smov [#allocation3]  }
  0x1c   : > { %p2207_p3 = scmp.ne.s32.totalorder %s257_s20, %s2206_s30  ;;  %s2211_s16 = sshll.u32 %s2335_s8, 4  ;;  %s2212_s16 = int_to_ptr.vmem [resolvable:$false] %s2211_s16 }
  0x1d   : > { %s255_s18 = scalar_lea.hbm %s3129_s1, %s1617_s15  ;;  %s2213_s7 = scalar_lea.vmem %s2212_s16, 16384 }
  0x1e   : > { %p2209_p5 = pnand %p2207_p3, %p2195_p2  ;;  %p2214_p4 = scmp.lt.s32.totalorder %s257_s20, %s2212_s16 }
  0x1f   : > { %p2215_p7 = scmp.lt.s32.totalorder %s2213_s7, %s2206_s30 }
  0x20   : > { %p2210_p6 = pneg %p2209_p5 }
  0x21   : > { %p2216_p10 = por %p2215_p7, %p2214_p4 }
  0x23   : > { %p2217_p13 = pnand %p2216_p10, %p2210_p6 }
  0x25   : > { %2220 = shalt.err (!%p2217_p13)
}
  0x26   : > { %s2336_s17 = smov 512   ;;  %s2337_s19 = smov 32  }
  0x27   : > { %2114 = dma.hbm_to_vmem [thread:$0]  (!%p2456_p0), %s255_s18, 8192, %s257_s20, %s246_s28, %s2336_s17, %s2336_s17, %s2337_s19  }
  0x28   : > { %p285_p3 = scmp.lt.s32.totalorder %s2333_s26, 3  ;;  %s276_s30 = scalar_lea.hbm %s3113_s2, %s1617_s15 }
  0x29   : > { %s3132_s7 = sshll.u32 %s2443_s13, 9  ;;  %s267_s11 = scalar_lea.sflag [#allocation7], %s2443_s13 }
  0x2a   : > { %p2477_p5 = pnand %p1605_p1, %p285_p3  ;;  %s270_s1 = scalar_lea.vmem [#allocation6], %s3132_s7 }
  0x2b   : > { %s277_s29 = sshll.u32 %s270_s1, 4  ;;  %s2338_s18 = smov [#allocation6]   ;;  %s278_s29 = int_to_ptr.vmem [resolvable:$true] %s277_s29 }
  0x2c   : > { %s2234_s23 = scalar_lea.vmem %s278_s29, 8192  ;;  %s2239_s20 = sshll.u32 %s2338_s18, 4  ;;  %s2240_s20 = int_to_ptr.vmem [resolvable:$false] %s2239_s20 }
  0x2d   : > { %p2235_p6 = scmp.ne.s32.totalorder %s278_s29, %s2234_s23  ;;  %s2241_s14 = scalar_lea.vmem %s2240_s20, 16384 }
  0x2e   : > { %p2242_p10 = scmp.lt.s32.totalorder %s278_s29, %s2240_s20  ;;  %p2243_p1 = scmp.lt.s32.totalorder %s2241_s14, %s2234_s23 }
  0x2f   : > { %p2237_p4 = pnand %p2235_p6, %p2195_p2 }
  0x30   : > { %p2244_p13 = por %p2243_p1, %p2242_p10 }
  0x31   : > { %p2238_p7 = pneg %p2237_p4 }
  0x33   : > { %p2245_p3 = pnand %p2244_p13, %p2238_p7 }
  0x35   : > { %2248 = shalt.err (!%p2245_p3)
}
  0x36   : > { %2117 = dma.hbm_to_vmem [thread:$0]  (!%p2456_p0), %s276_s30, 8192, %s278_s29, %s267_s11, %s2336_s17, %s2336_s17, %s2337_s19  }
  0x37   : > { %289 = sbr.rel (%p2477_p5) target bundleno = 2270 (0x8de), region = 44  ;;  %s2492_s1 = sand.u32 (!%p2477_p5), 1, %s2317_s22  }
  0x38   : > { %s1606_s13 = sshll.u32 (!%p2477_p5), %s2492_s1, 9  ;;  %s292_s15 = scalar_lea.sflag (!%p2477_p5), [#allocation4], %s2492_s1 }
  0x39   : > { %s2496_s28 = scalar_lea.vmem (!%p2477_p5), [#allocation3], %s1606_s13 }
  0x3c   : > { %2300 = dma.done.wait (%p2425_p8), %s292_s15, 8192  }
  0x3d   : > { %2302 = vsyncadd (%p2425_p8), %s292_s15, 4294959104  ;;  %s301_s23 = scalar_lea.sflag [#allocation7], %s2492_s1  ;;  %s2503_s29 = scalar_lea.vmem [#allocation6], %s1606_s13 }
  0x3e   : > { %2304 = dma.done.wait (%p2425_p8), %s301_s23, 8192  }
  0x3f   : > { %2306 = vsyncadd (%p2425_p8), %s301_s23, 4294959104  ;;  %p345_p0 = scmp.lt.s32.totalorder %s2325_s24, 1  ;;  %v2339_v0 = vmov 0.0   ;;  %v494_v1 = vld [vmem:[%s3114_s3 + $0x68] sm:$0xff]  ;;  %v493_v2 = vld [vmem:[%s3114_s3 + $0x60] sm:$0xff]  ;;  %vm497_vm0 = vcmask 261120   ;;  %v643_v42 = vlaneseq }
  0x40   : > { %565 = vmatprep.mubr.f32.mxu0 %v2339_v0  ;;  %636 = vmatprep.mubr.f32.mxu1 %v2339_v0  ;;  %v490_v3 = vld [vmem:[%s3114_s3 + $0x48] sm:$0xff]  ;;  %v489_v4 = vld [vmem:[%s3114_s3 + $0x40] sm:$0xff]  ;;  %vm2340_vm1 = vmmov 0   ;;  %v496_v27 = vld [vmem:[%s3114_s3 + $0x78] sm:$0xff]  ;;  %v2341_v45 = vmov -1e+30  }
  0x41   : > { %s346_s11 = scalar_select %p345_p0, %s2325_s24, 1  ;;  %525 = vmatprep.subr.mxu0 %v494_v1  ;;  %v486_v5 = vld [vmem:[%s3114_s3 + $0x28] sm:$0xff]  ;;  %v485_v6 = vld [vmem:[%s3114_s3 + $0x20] sm:$0xff]  ;;  %v495_v28 = vld [vmem:[%s3114_s3 + $0x70] sm:$0xff]  ;;  %596 = vmatprep.subr.mxu1 %v496_v27  ;;  %v644_v43 = vand.u32 127, %v643_v42 }
  0x42   : > { %526 = vmatpush1.msra.mxu0 %v493_v2  ;;  %v482_v7 = vld [vmem:[%s3114_s3 + $0x8] sm:$0xff]  ;;  %v481_v8 = vld [vmem:[%s3114_s3] sm:$0xff]  ;;  %v492_v29 = vld [vmem:[%s3114_s3 + $0x58] sm:$0xff]  ;;  %597 = vmatpush1.msra.mxu1 %v495_v28  ;;  %s1608_s23 = sshll.u32 %s2492_s1, 3  ;;  %s1614_s17 = sshll.u32 %s2325_s24, 7 }
  0x43   : > { %s1609_s16 = sshll.u32 %s346_s11, 3  ;;  %527 = vmatprep.subr.mxu0 %v490_v3  ;;  %v413_v10 = vld [vmem:[%s2496_s28 + $0x1e0] sm:$0xff]  ;;  %v491_v30 = vld [vmem:[%s3114_s3 + $0x50] sm:$0xff]  ;;  %v488_v31 = vld [vmem:[%s3114_s3 + $0x38] sm:$0xff]  ;;  %598 = vmatprep.subr.mxu1 %v492_v29  ;;  %vm645_vm2 = vcmp.lt.s32.totalorder %v644_v43, 16  ;;  %s344_s19 = scalar_lea.vmem [#allocation8], %s1608_s23 }
  0x44   : > { %s351_s11 = scalar_lea.vmem %s3111_s0, %s1609_s16  ;;  %528 = vmatpush1.msra.mxu0 %v489_v4  ;;  %v409_v11 = vld [vmem:[%s2496_s28 + $0x1c0] sm:$0xff]  ;;  %v487_v32 = vld [vmem:[%s3114_s3 + $0x30] sm:$0xff]  ;;  %599 = vmatpush1.msra.mxu1 %v491_v30  ;;  %v484_v33 = vld [vmem:[%s3114_s3 + $0x18] sm:$0xff]  ;;  %v2626_v46 = vsel %vm645_vm2, 0.0, %v2341_v45  ;;  %s1478_s8 = sshll.u32 %s344_s19, 4  ;;  %s1479_s8 = int_to_ptr.vmem [resolvable:$true] %s1478_s8 }
  0x45   : > { %529 = vmatprep.subr.mxu0 %v486_v5  ;;  %v2540_v9 = vld [vmem:[%s351_s11] sm:$0xff]  ;;  %600 = vmatprep.subr.mxu1 %v488_v31  ;;  %v483_v34 = vld [vmem:[%s3114_s3 + $0x10] sm:$0xff]  ;;  %v414_v62 = vld [vmem:[%s2496_s28 + $0x1e8] sm:$0xff]  ;;  %s1464_s16 = scalar_lea.sflag [#allocation5], %s2492_s1  ;;  %s2249_s7 = scalar_lea.vmem %s1479_s8, 128 }
  0x46   : > { %530 = vmatpush1.msra.mxu0 %v485_v6  ;;  %v405_v12 = vld [vmem:[%s2496_s28 + $0x1a0] sm:$0xff]  ;;  %601 = vmatpush1.msra.mxu1 %v487_v32  ;;  %v410_v1 = vld [vmem:[%s2496_s28 + $0x1c8] sm:$0xff]  ;;  %v415_v42 = vld [vmem:[%s2496_s28 + $0x1f0] sm:$0xff]  ;;  %p2250_p8 = scmp.ne.s32.totalorder %s1479_s8, %s2249_s7  ;;  %s2342_s18 = smov [#allocation8]  }
  0x47   : > { %531 = vmatprep.subr.mxu0 %v482_v7  ;;  %v401_v13 = vld [vmem:[%s2496_s28 + $0x180] sm:$0xff]  ;;  %602 = vmatprep.subr.mxu1 %v484_v33  ;;  %v406_v2 = vld [vmem:[%s2496_s28 + $0x1a8] sm:$0xff]  ;;  %v407_v45 = vld [vmem:[%s2496_s28 + $0x1b0] sm:$0xff]  ;;  %s2253_s24 = sshll.u32 %s2342_s18, 4  ;;  %s2254_s24 = int_to_ptr.vmem [resolvable:$false] %s2253_s24 }
  0x48   : > { %532 = vmatpush1.msra.mxu0 %v481_v8  ;;  %v397_v14 = vld [vmem:[%s2496_s28 + $0x160] sm:$0xff]  ;;  %603 = vmatpush1.msra.mxu1 %v483_v34  ;;  %v402_v3 = vld [vmem:[%s2496_s28 + $0x188] sm:$0xff]  ;;  %p2251_p2 = pnand %p2250_p8, %p2429_p9  ;;  %p2256_p6 = scmp.lt.s32.totalorder %s1479_s8, %s2254_s24 }
  0x49   : > { %1610 = vmatmul.mubr.msk.f32.vlgmr.msra.gmra.mxu0 %vm497_vm0, %v2540_v9  ;;  %1825 = vmatprep.subr.mxu0 %v2339_v0  ;;  %v393_v15 = vld [vmem:[%s2496_s28 + $0x140] sm:$0xff]  ;;  %v398_v4 = vld [vmem:[%s2496_s28 + $0x168] sm:$0xff] }
  0x4a   : > { %1826 = vmatpush3.xpose.msra.mxu0 %v413_v10  ;;  %v389_v16 = vld [vmem:[%s2496_s28 + $0x120] sm:$0xff]  ;;  %1857 = vmatprep.mubr.msk.f32.mxu0 %vm2340_vm1, %v2339_v0  ;;  %v394_v5 = vld [vmem:[%s2496_s28 + $0x148] sm:$0xff]  ;;  %p2252_p5 = pneg %p2251_p2 }
  0x4b   : > { %1827 = vmatprep.subr.mxu0 %v2339_v0  ;;  %v385_v17 = vld [vmem:[%s2496_s28 + $0x100] sm:$0xff]  ;;  %1611 = vmatmul.mubr.msk.f32.vlgmr.msra.gmra.mxu1 %vm497_vm0, %v2540_v9  ;;  %v390_v6 = vld [vmem:[%s2496_s28 + $0x128] sm:$0xff] }
  0x4c   : > { %v381_v18 = vld [vmem:[%s2496_s28 + $0xe0] sm:$0xff]  ;;  %1860 = vmatprep.subr.mxu1 %v2339_v0  ;;  %1892 = vmatprep.mubr.msk.f32.mxu1 %vm2340_vm1, %v2339_v0  ;;  %v386_v7 = vld [vmem:[%s2496_s28 + $0x108] sm:$0xff] }
  0x4d   : > { %v377_v19 = vld [vmem:[%s2496_s28 + $0xc0] sm:$0xff]  ;;  %v382_v8 = vld [vmem:[%s2496_s28 + $0xe8] sm:$0xff] }
  0x4e   : > { %1828 = vmatpush3.xpose.msra.mxu0 %v409_v11  ;;  %v373_v20 = vld [vmem:[%s2496_s28 + $0xa0] sm:$0xff]  ;;  %v378_v9 = vld [vmem:[%s2496_s28 + $0xc8] sm:$0xff] }
  0x4f   : > { %1829 = vmatprep.subr.mxu0 %v2339_v0  ;;  %v369_v21 = vld [vmem:[%s2496_s28 + $0x80] sm:$0xff]  ;;  %v374_v10 = vld [vmem:[%s2496_s28 + $0xa8] sm:$0xff] }
  0x50   : > { %v365_v22 = vld [vmem:[%s2496_s28 + $0x60] sm:$0xff]  ;;  %v370_v11 = vld [vmem:[%s2496_s28 + $0x88] sm:$0xff] }
  0x51   : > { %v361_v23 = vld [vmem:[%s2496_s28 + $0x40] sm:$0xff]  ;;  %v450_v30 = vld [vmem:[%s2503_s29 + $0x108] sm:$0xff] }
  0x52   : > { %1830 = vmatpush3.xpose.msra.mxu0 %v405_v12  ;;  %v357_v24 = vld [vmem:[%s2496_s28 + $0x20] sm:$0xff]  ;;  %v366_v12 = vld [vmem:[%s2496_s28 + $0x68] sm:$0xff] }
  0x53   : > { %1831 = vmatprep.subr.mxu0 %v2339_v0  ;;  %v353_v25 = vld [vmem:[%s2496_s28] sm:$0xff]  ;;  %v446_v31 = vld [vmem:[%s2503_s29 + $0xe8] sm:$0xff] }
  0x54   : > { %v477_v35 = vld [vmem:[%s2503_s29 + $0x1e0] sm:$0xff]  ;;  %v442_v32 = vld [vmem:[%s2503_s29 + $0xc8] sm:$0xff] }
  0x55   : > { %v473_v36 = vld [vmem:[%s2503_s29 + $0x1c0] sm:$0xff]  ;;  %1861 = vmatpush3.msra.mxu1 %v477_v35  ;;  %v438_v33 = vld [vmem:[%s2503_s29 + $0xa8] sm:$0xff] }
  0x56   : > { %1832 = vmatpush3.xpose.msra.mxu0 %v401_v13  ;;  %1862 = vmatprep.subr.mxu1 %v2339_v0  ;;  %v469_v37 = vld [vmem:[%s2503_s29 + $0x1a0] sm:$0xff]  ;;  %v362_v13 = vld [vmem:[%s2496_s28 + $0x48] sm:$0xff] }
  0x57   : > { %1833 = vmatprep.subr.mxu0 %v2339_v0  ;;  %1863 = vmatpush3.msra.mxu1 %v473_v36  ;;  %v465_v38 = vld [vmem:[%s2503_s29 + $0x180] sm:$0xff]  ;;  %v434_v34 = vld [vmem:[%s2503_s29 + $0x88] sm:$0xff] }
  0x58   : > { %1864 = vmatprep.subr.mxu1 %v2339_v0  ;;  %v461_v39 = vld [vmem:[%s2503_s29 + $0x160] sm:$0xff]  ;;  %v430_v35 = vld [vmem:[%s2503_s29 + $0x68] sm:$0xff] }
  0x59   : > { %1865 = vmatpush3.msra.mxu1 %v469_v37  ;;  %v457_v40 = vld [vmem:[%s2503_s29 + $0x140] sm:$0xff]  ;;  %v426_v36 = vld [vmem:[%s2503_s29 + $0x48] sm:$0xff] }
  0x5a   : > { %1834 = vmatpush3.xpose.msra.mxu0 %v397_v14  ;;  %1866 = vmatprep.subr.mxu1 %v2339_v0  ;;  %v453_v41 = vld [vmem:[%s2503_s29 + $0x120] sm:$0xff]  ;;  %v358_v14 = vld [vmem:[%s2496_s28 + $0x28] sm:$0xff] }
  0x5b   : > { %1835 = vmatprep.subr.mxu0 %v2339_v0  ;;  %1867 = vmatpush3.msra.mxu1 %v465_v38  ;;  %v449_v50 = vld [vmem:[%s2503_s29 + $0x100] sm:$0xff]  ;;  %v422_v37 = vld [vmem:[%s2503_s29 + $0x28] sm:$0xff] }
  0x5c   : > { %1868 = vmatprep.subr.mxu1 %v2339_v0  ;;  %v445_v51 = vld [vmem:[%s2503_s29 + $0xe0] sm:$0xff]  ;;  %v418_v38 = vld [vmem:[%s2503_s29 + $0x8] sm:$0xff] }
  0x5d   : > { %1869 = vmatpush3.msra.mxu1 %v461_v39  ;;  %v441_v52 = vld [vmem:[%s2503_s29 + $0xc0] sm:$0xff] }
  0x5e   : > { %1836 = vmatpush3.xpose.msra.mxu0 %v393_v15  ;;  %1870 = vmatprep.subr.mxu1 %v2339_v0  ;;  %v437_v53 = vld [vmem:[%s2503_s29 + $0xa0] sm:$0xff]  ;;  %v354_v15 = vld [vmem:[%s2496_s28 + $0x8] sm:$0xff] }
  0x5f   : > { %1837 = vmatprep.subr.mxu0 %v2339_v0  ;;  %1871 = vmatpush3.msra.mxu1 %v457_v40  ;;  %v433_v54 = vld [vmem:[%s2503_s29 + $0x80] sm:$0xff] }
  0x60   : > { %1872 = vmatprep.subr.mxu1 %v2339_v0  ;;  %v429_v55 = vld [vmem:[%s2503_s29 + $0x60] sm:$0xff] }
  0x61   : > { %1873 = vmatpush3.msra.mxu1 %v453_v41  ;;  %v425_v56 = vld [vmem:[%s2503_s29 + $0x40] sm:$0xff] }
  0x62   : > { %1838 = vmatpush3.xpose.msra.mxu0 %v389_v16  ;;  %1874 = vmatprep.subr.mxu1 %v2339_v0  ;;  %v421_v57 = vld [vmem:[%s2503_s29 + $0x20] sm:$0xff]  ;;  %v478_v16 = vld [vmem:[%s2503_s29 + $0x1e8] sm:$0xff] }
  0x63   : > { %1839 = vmatprep.subr.mxu0 %v2339_v0  ;;  %1875 = vmatpush3.msra.mxu1 %v449_v50  ;;  %v417_v58 = vld [vmem:[%s2503_s29] sm:$0xff]  ;;  %v391_v50 = vld [vmem:[%s2496_s28 + $0x130] sm:$0xff] }
  0x64   : > { %1876 = vmatprep.subr.mxu1 %v2339_v0 }
  0x65   : > { %1877 = vmatpush3.msra.mxu1 %v445_v51  ;;  %v387_v51 = vld [vmem:[%s2496_s28 + $0x110] sm:$0xff] }
  0x66   : > { %1840 = vmatpush3.xpose.msra.mxu0 %v385_v17  ;;  %1878 = vmatprep.subr.mxu1 %v2339_v0  ;;  %v474_v17 = vld [vmem:[%s2503_s29 + $0x1c8] sm:$0xff] }
  0x67   : > { %1841 = vmatprep.subr.mxu0 %v2339_v0  ;;  %1879 = vmatpush3.msra.mxu1 %v441_v52  ;;  %v383_v52 = vld [vmem:[%s2496_s28 + $0xf0] sm:$0xff] }
  0x68   : > { %1880 = vmatprep.subr.mxu1 %v2339_v0 }
  0x69   : > { %1881 = vmatpush3.msra.mxu1 %v437_v53  ;;  %v379_v53 = vld [vmem:[%s2496_s28 + $0xd0] sm:$0xff] }
  0x6a   : > { %1842 = vmatpush3.xpose.msra.mxu0 %v381_v18  ;;  %1882 = vmatprep.subr.mxu1 %v2339_v0  ;;  %v470_v18 = vld [vmem:[%s2503_s29 + $0x1a8] sm:$0xff] }
  0x6b   : > { %1843 = vmatprep.subr.mxu0 %v2339_v0  ;;  %1883 = vmatpush3.msra.mxu1 %v433_v54  ;;  %v375_v54 = vld [vmem:[%s2496_s28 + $0xb0] sm:$0xff] }
  0x6c   : > { %1884 = vmatprep.subr.mxu1 %v2339_v0 }
  0x6d   : > { %1885 = vmatpush3.msra.mxu1 %v429_v55  ;;  %v371_v55 = vld [vmem:[%s2496_s28 + $0x90] sm:$0xff] }
  0x6e   : > { %1844 = vmatpush3.xpose.msra.mxu0 %v377_v19  ;;  %1886 = vmatprep.subr.mxu1 %v2339_v0  ;;  %v466_v19 = vld [vmem:[%s2503_s29 + $0x188] sm:$0xff] }
  0x6f   : > { %1845 = vmatprep.subr.mxu0 %v2339_v0  ;;  %1887 = vmatpush3.msra.mxu1 %v425_v56  ;;  %v367_v56 = vld [vmem:[%s2496_s28 + $0x70] sm:$0xff] }
  0x70   : > { %1888 = vmatprep.subr.mxu1 %v2339_v0 }
  0x71   : > { %1889 = vmatpush3.msra.mxu1 %v421_v57  ;;  %v363_v57 = vld [vmem:[%s2496_s28 + $0x50] sm:$0xff] }
  0x72   : > { %1846 = vmatpush3.xpose.msra.mxu0 %v373_v20  ;;  %1890 = vmatprep.subr.mxu1 %v2339_v0  ;;  %v462_v20 = vld [vmem:[%s2503_s29 + $0x168] sm:$0xff] }
  0x73   : > { %1847 = vmatprep.subr.mxu0 %v2339_v0  ;;  %1891 = vmatpush3.msra.mxu1 %v417_v58  ;;  %v359_v58 = vld [vmem:[%s2496_s28 + $0x30] sm:$0xff] }
  0x74   : > { %1895 = vmatprep.subr.mxu1 %v2339_v0 }
  0x76   : > { %1848 = vmatpush3.xpose.msra.mxu0 %v369_v21  ;;  %v458_v21 = vld [vmem:[%s2503_s29 + $0x148] sm:$0xff] }
  0x77   : > { %1849 = vmatprep.subr.mxu0 %v2339_v0 }
  0x7a   : > { %1850 = vmatpush3.xpose.msra.mxu0 %v365_v22  ;;  %v454_v22 = vld [vmem:[%s2503_s29 + $0x128] sm:$0xff] }
  0x7b   : > { %1851 = vmatprep.subr.mxu0 %v2339_v0 }
  0x7e   : > { %1852 = vmatpush3.xpose.msra.mxu0 %v361_v23 }
  0x7f   : > { %1853 = vmatprep.subr.mxu0 %v2339_v0 }
  0x82   : > { %1854 = vmatpush3.xpose.msra.mxu0 %v357_v24 }
  0x83   : > { %1855 = vmatprep.subr.mxu0 %v2339_v0 }
  0x86   : > { %1856 = vmatpush3.xpose.msra.mxu0 %v353_v25 }
  0x87   : > { %1930 = vmatprep.subr.mxu0 %v2339_v0 }
 0x109   : > { %v567_v26 = vpop.f32.mrf.mxu0 }
 0x10a   : > { %1858 = vmatmul.mubr.f32.vlgmr.msra.gmra.mxu0 %v567_v26 }
 0x10b   : > { %1962 = vmatprep.mubr.msk.f32.mxu0 %vm2340_vm1, %v2339_v0  ;;  %v2624_v44 = vpop.f32.mrf.mxu0  ;;  %1931 = vmatpush3.msra.mxu0 %v478_v16  ;;  %v2701_v23 = vpop.f32.mrf.mxu1  ;;  %v427_v16 = vld [vmem:[%s2503_s29 + $0x50] sm:$0xff] }
 0x10c   : > { %1932 = vmatprep.subr.mxu0 %v2339_v0 }
 0x10d   : > { %1933 = vmatpush3.msra.mxu0 %v474_v17  ;;  %v2703_v24 = vpop.f32.mrf.mxu1  ;;  %v423_v17 = vld [vmem:[%s2503_s29 + $0x30] sm:$0xff] }
 0x10e   : > { %1934 = vmatprep.subr.mxu0 %v2339_v0 }
 0x10f   : > { %1935 = vmatpush3.msra.mxu0 %v470_v18  ;;  %v419_v18 = vld [vmem:[%s2503_s29 + $0x10] sm:$0xff] }
 0x110   : > { %1936 = vmatprep.subr.mxu0 %v2339_v0 }
 0x111   : > { %1937 = vmatpush3.msra.mxu0 %v466_v19 }
 0x112   : > { %1938 = vmatprep.subr.mxu0 %v2339_v0 }
 0x113   : > { %1939 = vmatpush3.msra.mxu0 %v462_v20 }
 0x114   : > { %1940 = vmatprep.subr.mxu0 %v2339_v0 }
 0x115   : > { %1941 = vmatpush3.msra.mxu0 %v458_v21 }
 0x116   : > { %1942 = vmatprep.subr.mxu0 %v2339_v0 }
 0x117   : > { %1943 = vmatpush3.msra.mxu0 %v454_v22  ;;  %v416_v22 = vld [vmem:[%s2496_s28 + $0x1f8] sm:$0xff] }
 0x118   : > { %1944 = vmatprep.subr.mxu0 %v2339_v0 }
 0x119   : > { %1945 = vmatpush3.msra.mxu0 %v450_v30  ;;  %v396_v30 = vld [vmem:[%s2496_s28 + $0x158] sm:$0xff] }
 0x11a   : > { %1946 = vmatprep.subr.mxu0 %v2339_v0 }
 0x11b   : > { %1947 = vmatpush3.msra.mxu0 %v446_v31  ;;  %v392_v31 = vld [vmem:[%s2496_s28 + $0x138] sm:$0xff] }
 0x11c   : > { %1948 = vmatprep.subr.mxu0 %v2339_v0 }
 0x11d   : > { %1949 = vmatpush3.msra.mxu0 %v442_v32  ;;  %v388_v32 = vld [vmem:[%s2496_s28 + $0x118] sm:$0xff] }
 0x11e   : > { %1950 = vmatprep.subr.mxu0 %v2339_v0 }
 0x11f   : > { %1951 = vmatpush3.msra.mxu0 %v438_v33  ;;  %v384_v33 = vld [vmem:[%s2496_s28 + $0xf8] sm:$0xff] }
 0x120   : > { %1952 = vmatprep.subr.mxu0 %v2339_v0 }
 0x121   : > { %1953 = vmatpush3.msra.mxu0 %v434_v34  ;;  %v380_v34 = vld [vmem:[%s2496_s28 + $0xd8] sm:$0xff] }
 0x122   : > { %1954 = vmatprep.subr.mxu0 %v2339_v0 }
 0x123   : > { %1955 = vmatpush3.msra.mxu0 %v430_v35  ;;  %v376_v35 = vld [vmem:[%s2496_s28 + $0xb8] sm:$0xff] }
 0x124   : > { %1956 = vmatprep.subr.mxu0 %v2339_v0 }
 0x125   : > { %1957 = vmatpush3.msra.mxu0 %v426_v36  ;;  %v372_v36 = vld [vmem:[%s2496_s28 + $0x98] sm:$0xff] }
 0x126   : > { %1958 = vmatprep.subr.mxu0 %v2339_v0 }
 0x127   : > { %1959 = vmatpush3.msra.mxu0 %v422_v37  ;;  %v368_v37 = vld [vmem:[%s2496_s28 + $0x78] sm:$0xff] }
 0x128   : > { %1960 = vmatprep.subr.mxu0 %v2339_v0 }
 0x129   : > { %1961 = vmatpush3.msra.mxu0 %v418_v38  ;;  %v364_v38 = vld [vmem:[%s2496_s28 + $0x58] sm:$0xff] }
 0x12a   : > { %1965 = vmatprep.subr.mxu0 %v2339_v0 }
 0x1ca   : > { %v713_v47 = vpop.f32.mrf.mxu0 }
 0x1cb   : > { %v714_v48 = vadd.f32 %v713_v47, %v2626_v46  ;;  %v403_v47 = vld [vmem:[%s2496_s28 + $0x190] sm:$0xff] }
 0x1cc   : > { %v1859_v49 = vpop.f32.mrf.mxu0 }
 0x1cd   : > { %717 = vmax.xlane.f32.xlu0 %v714_v48  ;;  %v395_v49 = vld [vmem:[%s2496_s28 + $0x150] sm:$0xff] }
 0x256   : > { %v718_v59 = vpop.xlane.xlu0 %717 }
 0x257   : > { %v719_v60 = vsub.f32 %v714_v48, %v718_v59  ;;  %v399_v48 = vld [vmem:[%s2496_s28 + $0x170] sm:$0xff] }
 0x258   : > { %v355_v59 = vld [vmem:[%s2496_s28 + $0x10] sm:$0xff] }
 0x259   : > { %v720_v61 = vmul.f32 1.442695, %v719_v60  ;;  %v479_v60 = vld [vmem:[%s2503_s29 + $0x1f0] sm:$0xff] }
 0x25b   : > { %2177 = vpow2.f32 %v720_v61  ;;  %v475_v61 = vld [vmem:[%s2503_s29 + $0x1d0] sm:$0xff] }
 0x268   : > { %v2648_v63 = vpop.eup %2177 }
 0x269   : > { %1893 = vmatmul.mubr.f32.vlgmr.msra.gmra.mxu1 %v2648_v63 }
 0x26a   : > { %1896 = vmatpush3.xpose.msra.mxu1 %v414_v62  ;;  %1927 = vmatprep.mubr.msk.f32.mxu1 %vm2340_vm1, %v2339_v0  ;;  %v471_v62 = vld [vmem:[%s2503_s29 + $0x1b0] sm:$0xff] }
 0x26b   : > { %1897 = vmatprep.subr.mxu1 %v2339_v0 }
 0x26e   : > { %1898 = vmatpush3.xpose.msra.mxu1 %v410_v1  ;;  %v467_v1 = vld [vmem:[%s2503_s29 + $0x190] sm:$0xff] }
 0x26f   : > { %1899 = vmatprep.subr.mxu1 %v2339_v0 }
 0x272   : > { %1900 = vmatpush3.xpose.msra.mxu1 %v406_v2  ;;  %v463_v2 = vld [vmem:[%s2503_s29 + $0x170] sm:$0xff] }
 0x273   : > { %1901 = vmatprep.subr.mxu1 %v2339_v0 }
 0x276   : > { %1902 = vmatpush3.xpose.msra.mxu1 %v402_v3  ;;  %v459_v3 = vld [vmem:[%s2503_s29 + $0x150] sm:$0xff] }
 0x277   : > { %1903 = vmatprep.subr.mxu1 %v2339_v0 }
 0x27a   : > { %1904 = vmatpush3.xpose.msra.mxu1 %v398_v4  ;;  %v455_v4 = vld [vmem:[%s2503_s29 + $0x130] sm:$0xff] }
 0x27b   : > { %1905 = vmatprep.subr.mxu1 %v2339_v0 }
 0x27e   : > { %1906 = vmatpush3.xpose.msra.mxu1 %v394_v5 }
 0x27f   : > { %1907 = vmatprep.subr.mxu1 %v2339_v0 }
 0x282   : > { %1908 = vmatpush3.xpose.msra.mxu1 %v390_v6 }
 0x283   : > { %1909 = vmatprep.subr.mxu1 %v2339_v0 }
 0x286   : > { %1910 = vmatpush3.xpose.msra.mxu1 %v386_v7 }
 0x287   : > { %1911 = vmatprep.subr.mxu1 %v2339_v0 }
 0x28a   : > { %1912 = vmatpush3.xpose.msra.mxu1 %v382_v8 }
 0x28b   : > { %1913 = vmatprep.subr.mxu1 %v2339_v0 }
 0x28e   : > { %1914 = vmatpush3.xpose.msra.mxu1 %v378_v9 }
 0x28f   : > { %1915 = vmatprep.subr.mxu1 %v2339_v0 }
 0x292   : > { %1916 = vmatpush3.xpose.msra.mxu1 %v374_v10  ;;  %v451_v10 = vld [vmem:[%s2503_s29 + $0x110] sm:$0xff] }
 0x293   : > { %1917 = vmatprep.subr.mxu1 %v2339_v0 }
 0x296   : > { %1918 = vmatpush3.xpose.msra.mxu1 %v370_v11  ;;  %v447_v11 = vld [vmem:[%s2503_s29 + $0xf0] sm:$0xff] }
 0x297   : > { %1919 = vmatprep.subr.mxu1 %v2339_v0 }
 0x29a   : > { %1920 = vmatpush3.xpose.msra.mxu1 %v366_v12  ;;  %v443_v12 = vld [vmem:[%s2503_s29 + $0xd0] sm:$0xff] }
 0x29b   : > { %1921 = vmatprep.subr.mxu1 %v2339_v0 }
 0x29e   : > { %1922 = vmatpush3.xpose.msra.mxu1 %v362_v13  ;;  %v439_v13 = vld [vmem:[%s2503_s29 + $0xb0] sm:$0xff] }
 0x29f   : > { %1923 = vmatprep.subr.mxu1 %v2339_v0 }
 0x2a2   : > { %1924 = vmatpush3.xpose.msra.mxu1 %v358_v14  ;;  %v435_v14 = vld [vmem:[%s2503_s29 + $0x90] sm:$0xff] }
 0x2a3   : > { %1925 = vmatprep.subr.mxu1 %v2339_v0 }
 0x2a6   : > { %1926 = vmatpush3.xpose.msra.mxu1 %v354_v15  ;;  %v431_v15 = vld [vmem:[%s2503_s29 + $0x70] sm:$0xff] }
 0x2a7   : > { %2000 = vmatprep.subr.mxu1 %v2339_v0 }
 0x2a9   : > { %1928 = vmatmul.mubr.f32.vlgmr.msra.gmra.mxu1 %v2624_v44  ;;  %v411_v44 = vld [vmem:[%s2496_s28 + $0x1d0] sm:$0xff] }
 0x2aa   : > { %2032 = vmatprep.mubr.msk.f32.mxu1 %vm2340_vm1, %v2339_v0  ;;  %2001 = vmatpush3.msra.mxu1 %v479_v60  ;;  %v1282_v60 = vld [vmem:[%s3115_s4 + $0xf8] sm:$0xff] }
 0x2ab   : > { %2002 = vmatprep.subr.mxu1 %v2339_v0 }
 0x2ac   : > { %2003 = vmatpush3.msra.mxu1 %v475_v61 }
 0x2ad   : > { %2004 = vmatprep.subr.mxu1 %v2339_v0 }
 0x2ae   : > { %2005 = vmatpush3.msra.mxu1 %v471_v62 }
 0x2af   : > { %2006 = vmatprep.subr.mxu1 %v2339_v0 }
 0x2b0   : > { %2007 = vmatpush3.msra.mxu1 %v467_v1 }
 0x2b1   : > { %2008 = vmatprep.subr.mxu1 %v2339_v0 }
 0x2b2   : > { %2009 = vmatpush3.msra.mxu1 %v463_v2 }
 0x2b3   : > { %2010 = vmatprep.subr.mxu1 %v2339_v0 }
 0x2b4   : > { %2011 = vmatpush3.msra.mxu1 %v459_v3 }
 0x2b5   : > { %2012 = vmatprep.subr.mxu1 %v2339_v0 }
 0x2b6   : > { %2013 = vmatpush3.msra.mxu1 %v455_v4  ;;  %v1266_v4 = vld [vmem:[%s3115_s4 + $0x78] sm:$0xff] }
 0x2b7   : > { %2014 = vmatprep.subr.mxu1 %v2339_v0 }
 0x2b8   : > { %2015 = vmatpush3.msra.mxu1 %v451_v10  ;;  %v1279_v10 = vld [vmem:[%s3115_s4 + $0xe0] sm:$0xff] }
 0x2b9   : > { %2016 = vmatprep.subr.mxu1 %v2339_v0 }
 0x2ba   : > { %2017 = vmatpush3.msra.mxu1 %v447_v11  ;;  %v1263_v11 = vld [vmem:[%s3115_s4 + $0x60] sm:$0xff] }
 0x2bb   : > { %2018 = vmatprep.subr.mxu1 %v2339_v0 }
 0x2bc   : > { %2019 = vmatpush3.msra.mxu1 %v443_v12  ;;  %v1278_v12 = vld [vmem:[%s3115_s4 + $0xd8] sm:$0xff] }
 0x2bd   : > { %2020 = vmatprep.subr.mxu1 %v2339_v0 }
 0x2be   : > { %2021 = vmatpush3.msra.mxu1 %v439_v13  ;;  %v1262_v13 = vld [vmem:[%s3115_s4 + $0x58] sm:$0xff] }
 0x2bf   : > { %2022 = vmatprep.subr.mxu1 %v2339_v0 }
 0x2c0   : > { %2023 = vmatpush3.msra.mxu1 %v435_v14  ;;  %v1277_v14 = vld [vmem:[%s3115_s4 + $0xd0] sm:$0xff] }
 0x2c1   : > { %2024 = vmatprep.subr.mxu1 %v2339_v0 }
 0x2c2   : > { %2025 = vmatpush3.msra.mxu1 %v431_v15  ;;  %v1261_v15 = vld [vmem:[%s3115_s4 + $0x50] sm:$0xff] }
 0x2c3   : > { %2026 = vmatprep.subr.mxu1 %v2339_v0 }
 0x2c4   : > { %2027 = vmatpush3.msra.mxu1 %v427_v16  ;;  %v1276_v16 = vld [vmem:[%s3115_s4 + $0xc8] sm:$0xff] }
 0x2c5   : > { %2028 = vmatprep.subr.mxu1 %v2339_v0 }
 0x2c6   : > { %2029 = vmatpush3.msra.mxu1 %v423_v17  ;;  %v1260_v17 = vld [vmem:[%s3115_s4 + $0x48] sm:$0xff] }
 0x2c7   : > { %2030 = vmatprep.subr.mxu1 %v2339_v0 }
 0x2c8   : > { %2031 = vmatpush3.msra.mxu1 %v419_v18  ;;  %v1314_v18 = vld [vmem:[%s3115_s4 + $0x1f8] sm:$0xff] }
 0x2c9   : > { %2035 = vmatprep.subr.mxu1 %v2339_v0 }
 0x329   : > { %v2705_v25 = vpop.f32.mrf.mxu1 }
 0x32b   : > { %v1894_v26 = vpop.f32.mrf.mxu1 }
 0x32c   : > { %v412_v26 = vld [vmem:[%s2496_s28 + $0x1d8] sm:$0xff] }
 0x369   : > { %v863_v27 = vpop.f32.mrf.mxu1 }
 0x36a   : > { %v864_v28 = vadd.f32 %v863_v27, %v2626_v46  ;;  %v408_v27 = vld [vmem:[%s2496_s28 + $0x1b8] sm:$0xff] }
 0x36b   : > { %v1929_v29 = vpop.f32.mrf.mxu1 }
 0x36c   : > { %867 = vmax.xlane.f32.xlu0 %v864_v28  ;;  %v400_v29 = vld [vmem:[%s2496_s28 + $0x178] sm:$0xff] }
 0x3f5   : > { %v868_v39 = vpop.xlane.xlu0 %867 }
 0x3f6   : > { %v869_v40 = vsub.f32 %v864_v28, %v868_v39  ;;  %v404_v28 = vld [vmem:[%s2496_s28 + $0x198] sm:$0xff] }
 0x3f7   : > { %v360_v39 = vld [vmem:[%s2496_s28 + $0x38] sm:$0xff] }
 0x3f8   : > { %v870_v41 = vmul.f32 1.442695, %v869_v40  ;;  %v356_v40 = vld [vmem:[%s2496_s28 + $0x18] sm:$0xff]  ;;  %s1476_s28 = scalar_lea.hbm %s3117_s6, %s1614_s17 }
 0x3fa   : > { %2179 = vpow2.f32 %v870_v41  ;;  %v480_v41 = vld [vmem:[%s2503_s29 + $0x1f8] sm:$0xff] }
 0x407   : > { %v2180_v43 = vpop.eup %2179 }
 0x408   : > { %872 = vadd.xlane.f32.xlu0 %v2180_v43  ;;  %1963 = vmatmul.mubr.f32.vlgmr.msra.gmra.mxu0 %v2180_v43  ;;  %v472_v43 = vld [vmem:[%s2503_s29 + $0x1b8] sm:$0xff] }
 0x409   : > { %1966 = vmatpush3.xpose.msra.mxu0 %v415_v42  ;;  %1997 = vmatprep.mubr.msk.f32.mxu0 %vm2340_vm1, %v2339_v0  ;;  %v476_v42 = vld [vmem:[%s2503_s29 + $0x1d8] sm:$0xff] }
 0x40a   : > { %1967 = vmatprep.subr.mxu0 %v2339_v0 }
 0x40d   : > { %1968 = vmatpush3.xpose.msra.mxu0 %v411_v44  ;;  %v468_v44 = vld [vmem:[%s2503_s29 + $0x198] sm:$0xff] }
 0x40e   : > { %1969 = vmatprep.subr.mxu0 %v2339_v0 }
 0x411   : > { %1970 = vmatpush3.xpose.msra.mxu0 %v407_v45  ;;  %v464_v45 = vld [vmem:[%s2503_s29 + $0x178] sm:$0xff] }
 0x412   : > { %1971 = vmatprep.subr.mxu0 %v2339_v0 }
 0x415   : > { %1972 = vmatpush3.xpose.msra.mxu0 %v403_v47  ;;  %v460_v47 = vld [vmem:[%s2503_s29 + $0x158] sm:$0xff] }
 0x416   : > { %1973 = vmatprep.subr.mxu0 %v2339_v0 }
 0x419   : > { %1974 = vmatpush3.xpose.msra.mxu0 %v399_v48 }
 0x41a   : > { %1975 = vmatprep.subr.mxu0 %v2339_v0 }
 0x41d   : > { %1976 = vmatpush3.xpose.msra.mxu0 %v395_v49 }
 0x41e   : > { %1977 = vmatprep.subr.mxu0 %v2339_v0 }
 0x421   : > { %1978 = vmatpush3.xpose.msra.mxu0 %v391_v50 }
 0x422   : > { %1979 = vmatprep.subr.mxu0 %v2339_v0 }
 0x425   : > { %1980 = vmatpush3.xpose.msra.mxu0 %v387_v51 }
 0x426   : > { %1981 = vmatprep.subr.mxu0 %v2339_v0 }
 0x429   : > { %1982 = vmatpush3.xpose.msra.mxu0 %v383_v52 }
 0x42a   : > { %1983 = vmatprep.subr.mxu0 %v2339_v0 }
 0x42d   : > { %1984 = vmatpush3.xpose.msra.mxu0 %v379_v53  ;;  %v452_v53 = vld [vmem:[%s2503_s29 + $0x118] sm:$0xff] }
 0x42e   : > { %1985 = vmatprep.subr.mxu0 %v2339_v0 }
 0x431   : > { %1986 = vmatpush3.xpose.msra.mxu0 %v375_v54  ;;  %v448_v54 = vld [vmem:[%s2503_s29 + $0xf8] sm:$0xff] }
 0x432   : > { %1987 = vmatprep.subr.mxu0 %v2339_v0 }
 0x435   : > { %1988 = vmatpush3.xpose.msra.mxu0 %v371_v55  ;;  %v444_v55 = vld [vmem:[%s2503_s29 + $0xd8] sm:$0xff] }
 0x436   : > { %1989 = vmatprep.subr.mxu0 %v2339_v0 }
 0x439   : > { %1990 = vmatpush3.xpose.msra.mxu0 %v367_v56  ;;  %v432_v56 = vld [vmem:[%s2503_s29 + $0x78] sm:$0xff] }
 0x43a   : > { %1991 = vmatprep.subr.mxu0 %v2339_v0 }
 0x43d   : > { %1992 = vmatpush3.xpose.msra.mxu0 %v363_v57  ;;  %v428_v57 = vld [vmem:[%s2503_s29 + $0x58] sm:$0xff] }
 0x43e   : > { %1993 = vmatprep.subr.mxu0 %v2339_v0 }
 0x441   : > { %1994 = vmatpush3.xpose.msra.mxu0 %v359_v58  ;;  %v424_v58 = vld [vmem:[%s2503_s29 + $0x38] sm:$0xff] }
 0x442   : > { %1995 = vmatprep.subr.mxu0 %v2339_v0 }
 0x445   : > { %1996 = vmatpush3.xpose.msra.mxu0 %v355_v59  ;;  %v420_v59 = vld [vmem:[%s2503_s29 + $0x18] sm:$0xff] }
 0x446   : > { %2070 = vmatprep.subr.mxu0 %v2339_v0 }
 0x448   : > { %1998 = vmatmul.mubr.f32.vlgmr.msra.gmra.mxu0 %v2701_v23 }
 0x449   : > { %2102 = vmatprep.mubr.msk.f32.mxu0 %vm2340_vm1, %v2339_v0  ;;  %2071 = vmatpush3.msra.mxu0 %v480_v41  ;;  %v1293_v41 = vld [vmem:[%s3115_s4 + $0x150] sm:$0xff] }
 0x44a   : > { %2072 = vmatprep.subr.mxu0 %v2339_v0 }
 0x44b   : > { %2073 = vmatpush3.msra.mxu0 %v476_v42  ;;  %v1255_v42 = vld [vmem:[%s3115_s4 + $0x20] sm:$0xff] }
 0x44c   : > { %2074 = vmatprep.subr.mxu0 %v2339_v0 }
 0x44d   : > { %2075 = vmatpush3.msra.mxu0 %v472_v43  ;;  %v1308_v43 = vld [vmem:[%s3115_s4 + $0x1c8] sm:$0xff] }
 0x44e   : > { %2076 = vmatprep.subr.mxu0 %v2339_v0 }
 0x44f   : > { %2077 = vmatpush3.msra.mxu0 %v468_v44  ;;  %v1270_v44 = vld [vmem:[%s3115_s4 + $0x98] sm:$0xff] }
 0x450   : > { %2078 = vmatprep.subr.mxu0 %v2339_v0 }
 0x451   : > { %2079 = vmatpush3.msra.mxu0 %v464_v45  ;;  %v1292_v45 = vld [vmem:[%s3115_s4 + $0x148] sm:$0xff] }
 0x452   : > { %2080 = vmatprep.subr.mxu0 %v2339_v0 }
 0x453   : > { %2081 = vmatpush3.msra.mxu0 %v460_v47  ;;  %v1254_v47 = vld [vmem:[%s3115_s4 + $0x18] sm:$0xff] }
 0x454   : > { %2082 = vmatprep.subr.mxu0 %v2339_v0 }
 0x491   : > { %v873_v62 = vpop.xlane.xlu0 %872 }
 0x4c8   : > { %v2777_v5 = vpop.f32.mrf.mxu0 }
 0x4ca   : > { %v1964_v6 = vpop.f32.mrf.mxu0 }
 0x508   : > { %v1013_v7 = vpop.f32.mrf.mxu0 }
 0x509   : > { %v1014_v8 = vadd.f32 %v1013_v7, %v2626_v46 }
 0x50a   : > { %v1999_v9 = vpop.f32.mrf.mxu0 }
 0x50b   : > { %1017 = vmax.xlane.f32.xlu1 %v1014_v8  ;;  %v1280_v9 = vld [vmem:[%s3115_s4 + $0xe8] sm:$0xff] }
 0x594   : > { %v1018_v19 = vpop.xlane.xlu1 %1017 }
 0x595   : > { %v1019_v20 = vsub.f32 %v1014_v8, %v1018_v19  ;;  %v1265_v8 = vld [vmem:[%s3115_s4 + $0x70] sm:$0xff]  ;;  %v1298_v19 = vld [vmem:[%s3115_s4 + $0x178] sm:$0xff] }
 0x597   : > { %v1020_v21 = vmul.f32 1.442695, %v1019_v20  ;;  %v1313_v20 = vld [vmem:[%s3115_s4 + $0x1f0] sm:$0xff] }
 0x599   : > { %2181 = vpow2.f32 %v1020_v21 }
 0x59a   : > { %2183 = vrcp.f32 %v873_v62  ;;  %v1303_v62 = vld [vmem:[%s3115_s4 + $0x1a0] sm:$0xff] }
 0x5a6   : > { %v2799_v23 = vpop.eup %2181 }
 0x5a7   : > { %2033 = vmatmul.mubr.f32.vlgmr.msra.gmra.mxu1 %v2799_v23  ;;  %v2184_v3 = vpop.eup %2183 }
 0x5a8   : > { %2036 = vmatpush3.xpose.msra.mxu1 %v416_v22  ;;  %2067 = vmatprep.mubr.msk.f32.mxu1 %vm2340_vm1, %v2339_v0  ;;  %v945_v7 = vmul.f32 %v2184_v3, %v2777_v5  ;;  %v1264_v5 = vld [vmem:[%s3115_s4 + $0x68] sm:$0xff]  ;;  %v1275_v22 = vld [vmem:[%s3115_s4 + $0xc0] sm:$0xff]  ;;  %v1301_v3 = vld [vmem:[%s3115_s4 + $0x190] sm:$0xff] }
 0x5a9   : > { %2037 = vmatprep.subr.mxu1 %v2339_v0 }
 0x5ac   : > { %2038 = vmatpush3.xpose.msra.mxu1 %v412_v26  ;;  %v1259_v26 = vld [vmem:[%s3115_s4 + $0x40] sm:$0xff] }
 0x5ad   : > { %2039 = vmatprep.subr.mxu1 %v2339_v0 }
 0x5b0   : > { %2040 = vmatpush3.xpose.msra.mxu1 %v408_v27  ;;  %v1312_v27 = vld [vmem:[%s3115_s4 + $0x1e8] sm:$0xff] }
 0x5b1   : > { %2041 = vmatprep.subr.mxu1 %v2339_v0 }
 0x5b4   : > { %2042 = vmatpush3.xpose.msra.mxu1 %v404_v28  ;;  %v1274_v28 = vld [vmem:[%s3115_s4 + $0xb8] sm:$0xff] }
 0x5b5   : > { %2043 = vmatprep.subr.mxu1 %v2339_v0 }
 0x5b8   : > { %2044 = vmatpush3.xpose.msra.mxu1 %v400_v29  ;;  %v1296_v29 = vld [vmem:[%s3115_s4 + $0x168] sm:$0xff] }
 0x5b9   : > { %2045 = vmatprep.subr.mxu1 %v2339_v0 }
 0x5bc   : > { %2046 = vmatpush3.xpose.msra.mxu1 %v396_v30  ;;  %v1258_v30 = vld [vmem:[%s3115_s4 + $0x38] sm:$0xff] }
 0x5bd   : > { %2047 = vmatprep.subr.mxu1 %v2339_v0 }
 0x5c0   : > { %2048 = vmatpush3.xpose.msra.mxu1 %v392_v31  ;;  %v1311_v31 = vld [vmem:[%s3115_s4 + $0x1e0] sm:$0xff] }
 0x5c1   : > { %2049 = vmatprep.subr.mxu1 %v2339_v0 }
 0x5c4   : > { %2050 = vmatpush3.xpose.msra.mxu1 %v388_v32  ;;  %v1273_v32 = vld [vmem:[%s3115_s4 + $0xb0] sm:$0xff] }
 0x5c5   : > { %2051 = vmatprep.subr.mxu1 %v2339_v0 }
 0x5c8   : > { %2052 = vmatpush3.xpose.msra.mxu1 %v384_v33  ;;  %v1295_v33 = vld [vmem:[%s3115_s4 + $0x160] sm:$0xff] }
 0x5c9   : > { %2053 = vmatprep.subr.mxu1 %v2339_v0 }
 0x5cc   : > { %2054 = vmatpush3.xpose.msra.mxu1 %v380_v34  ;;  %v1257_v34 = vld [vmem:[%s3115_s4 + $0x30] sm:$0xff] }
 0x5cd   : > { %2055 = vmatprep.subr.mxu1 %v2339_v0 }
 0x5d0   : > { %2056 = vmatpush3.xpose.msra.mxu1 %v376_v35  ;;  %v1310_v35 = vld [vmem:[%s3115_s4 + $0x1d8] sm:$0xff] }
 0x5d1   : > { %2057 = vmatprep.subr.mxu1 %v2339_v0 }
 0x5d4   : > { %2058 = vmatpush3.xpose.msra.mxu1 %v372_v36  ;;  %v1272_v36 = vld [vmem:[%s3115_s4 + $0xa8] sm:$0xff] }
 0x5d5   : > { %2059 = vmatprep.subr.mxu1 %v2339_v0 }
 0x5d8   : > { %2060 = vmatpush3.xpose.msra.mxu1 %v368_v37  ;;  %v1294_v37 = vld [vmem:[%s3115_s4 + $0x158] sm:$0xff] }
 0x5d9   : > { %2061 = vmatprep.subr.mxu1 %v2339_v0 }
 0x5dc   : > { %2062 = vmatpush3.xpose.msra.mxu1 %v364_v38  ;;  %v1256_v38 = vld [vmem:[%s3115_s4 + $0x28] sm:$0xff] }
 0x5dd   : > { %2063 = vmatprep.subr.mxu1 %v2339_v0 }
 0x5e0   : > { %2064 = vmatpush3.xpose.msra.mxu1 %v360_v39  ;;  %v1309_v39 = vld [vmem:[%s3115_s4 + $0x1d0] sm:$0xff] }
 0x5e1   : > { %2065 = vmatprep.subr.mxu1 %v2339_v0 }
 0x5e4   : > { %2066 = vmatpush3.xpose.msra.mxu1 %v356_v40  ;;  %v1271_v40 = vld [vmem:[%s3115_s4 + $0xa0] sm:$0xff] }
 0x5e5   : > { %1790 = vmatprep.subr.mxu1 %v1314_v18 }
 0x5e7   : > { %2068 = vmatmul.mubr.f32.vlgmr.msra.gmra.mxu1 %v2703_v24  ;;  %v456_v24 = vld [vmem:[%s2503_s29 + $0x138] sm:$0xff] }
 0x5e8   : > { %2083 = vmatpush3.msra.mxu0 %v456_v24  ;;  %1791 = vmatpush3.msra.mxu1 %v1298_v19  ;;  %v1307_v24 = vld [vmem:[%s3115_s4 + $0x1c0] sm:$0xff] }
 0x5e9   : > { %2084 = vmatprep.subr.mxu0 %v2339_v0  ;;  %1792 = vmatprep.subr.mxu1 %v1313_v20  ;;  %v1612_v19 = vld [vmem:[%s3116_s5] ss:$0 sm:$0xff] }
 0x5ea   : > { %2085 = vmatpush3.msra.mxu0 %v452_v53  ;;  %v1268_v53 = vld [vmem:[%s3115_s4 + $0x88] sm:$0xff] }
 0x5eb   : > { %2086 = vmatprep.subr.mxu0 %v2339_v0 }
 0x5ec   : > { %2087 = vmatpush3.msra.mxu0 %v448_v54  ;;  %v1290_v54 = vld [vmem:[%s3115_s4 + $0x138] sm:$0xff] }
 0x5ed   : > { %2088 = vmatprep.subr.mxu0 %v2339_v0 }
 0x5ee   : > { %2089 = vmatpush3.msra.mxu0 %v444_v55  ;;  %v1252_v55 = vld [vmem:[%s3115_s4 + $0x8] sm:$0xff] }
 0x5ef   : > { %2090 = vmatprep.subr.mxu0 %v2339_v0 }
 0x667   : > { %v2849_v48 = vpop.f32.mrf.mxu1 }
 0x669   : > { %v2034_v49 = vpop.f32.mrf.mxu1 }
 0x66a   : > { %v1269_v49 = vld [vmem:[%s3115_s4 + $0x90] sm:$0xff] }
 0x6a7   : > { %v1163_v50 = vpop.f32.mrf.mxu1 }
 0x6a8   : > { %v1164_v51 = vadd.f32 %v1163_v50, %v2626_v46  ;;  %v440_v46 = vld [vmem:[%s2503_s29 + $0xb8] sm:$0xff]  ;;  %v1291_v50 = vld [vmem:[%s3115_s4 + $0x140] sm:$0xff] }
 0x6a9   : > { %v2069_v52 = vpop.f32.mrf.mxu1  ;;  %2091 = vmatpush3.msra.mxu0 %v440_v46  ;;  %v1305_v46 = vld [vmem:[%s3115_s4 + $0x1b0] sm:$0xff] }
 0x6aa   : > { %1167 = vmax.xlane.f32.xlu1 %v1164_v51  ;;  %2092 = vmatprep.subr.mxu0 %v2339_v0  ;;  %v1306_v52 = vld [vmem:[%s3115_s4 + $0x1b8] sm:$0xff] }
 0x6ae   : > { %722 = vadd.xlane.f32.xlu1 %v2648_v63  ;;  %v436_v63 = vld [vmem:[%s2503_s29 + $0x98] sm:$0xff]  ;;  %s2255_s29 = scalar_lea.vmem %s2254_s24, 256 }
 0x6af   : > { %2093 = vmatpush3.msra.mxu0 %v436_v63  ;;  %p2257_p4 = scmp.lt.s32.totalorder %s2255_s29, %s2249_s7 }
 0x6b0   : > { %2094 = vmatprep.subr.mxu0 %v2339_v0 }
 0x6b1   : > { %2095 = vmatpush3.msra.mxu0 %v432_v56  ;;  %v1267_v56 = vld [vmem:[%s3115_s4 + $0x80] sm:$0xff]  ;;  %p2258_p7 = por %p2257_p4, %p2256_p6 }
 0x6b2   : > { %1022 = vadd.xlane.f32.xlu1 %v2799_v23  ;;  %2096 = vmatprep.subr.mxu0 %v2339_v0  ;;  %v1297_v23 = vld [vmem:[%s3115_s4 + $0x170] sm:$0xff] }
 0x6b3   : > { %2097 = vmatpush3.msra.mxu0 %v428_v57  ;;  %1793 = vmatpush3.msra.mxu1 %v1297_v23  ;;  %v1289_v57 = vld [vmem:[%s3115_s4 + $0x130] sm:$0xff]  ;;  %p2259_p10 = pnand %p2258_p7, %p2252_p5 }
 0x6b4   : > { %2098 = vmatprep.subr.mxu0 %v2339_v0  ;;  %1794 = vmatprep.subr.mxu1 %v1312_v27 }
 0x6b5   : > { %2099 = vmatpush3.msra.mxu0 %v424_v58  ;;  %1795 = vmatpush3.msra.mxu1 %v1296_v29  ;;  %v1251_v58 = vld [vmem:[%s3115_s4] sm:$0xff] }
 0x6b6   : > { %2100 = vmatprep.subr.mxu0 %v2339_v0  ;;  %v1281_v0 = vld [vmem:[%s3115_s4 + $0xf0] sm:$0xff]  ;;  %1796 = vmatprep.subr.mxu1 %v1311_v31 }
 0x6b7   : > { %2101 = vmatpush3.msra.mxu0 %v420_v59  ;;  %1797 = vmatpush3.msra.mxu1 %v1295_v33  ;;  %v1304_v59 = vld [vmem:[%s3115_s4 + $0x1a8] sm:$0xff] }
 0x6b8   : > { %1755 = vmatprep.subr.mxu0 %v1282_v60  ;;  %1798 = vmatprep.subr.mxu1 %v1310_v35  ;;  %v1288_v60 = vld [vmem:[%s3115_s4 + $0x128] sm:$0xff] }
 0x6b9   : > { %1799 = vmatpush3.msra.mxu1 %v1294_v37 }
 0x6ba   : > { %1800 = vmatprep.subr.mxu1 %v1309_v39 }
 0x6bb   : > { %1801 = vmatpush3.msra.mxu1 %v1293_v41 }
 0x6bc   : > { %1802 = vmatprep.subr.mxu1 %v1308_v43 }
 0x6bd   : > { %1803 = vmatpush3.msra.mxu1 %v1292_v45 }
 0x6be   : > { %1804 = vmatprep.subr.mxu1 %v1307_v24 }
 0x6bf   : > { %1805 = vmatpush3.msra.mxu1 %v1291_v50 }
 0x6c0   : > { %1806 = vmatprep.subr.mxu1 %v1306_v52 }
 0x6c1   : > { %1807 = vmatpush3.msra.mxu1 %v1290_v54 }
 0x6c2   : > { %1808 = vmatprep.subr.mxu1 %v1305_v46 }
 0x6c3   : > { %1809 = vmatpush3.msra.mxu1 %v1289_v57 }
 0x6c4   : > { %1810 = vmatprep.subr.mxu1 %v1304_v59 }
 0x6c5   : > { %1811 = vmatpush3.msra.mxu1 %v1288_v60 }
 0x6c6   : > { %1812 = vmatprep.subr.mxu1 %v1303_v62 }
 0x733   : > { %v1168_v61 = vpop.xlane.xlu1 %1167 }
 0x734   : > { %v1169_v1 = vsub.f32 %v1164_v51, %v1168_v61  ;;  %v1253_v51 = vld [vmem:[%s3115_s4 + $0x10] sm:$0xff] }
 0x736   : > { %v1170_v2 = vmul.f32 1.442695, %v1169_v1  ;;  %v1287_v1 = vld [vmem:[%s3115_s4 + $0x120] sm:$0xff] }
 0x737   : > { %v723_v21 = vpop.xlane.xlu1 %722  ;;  %1813 = vmatpush3.msra.mxu1 %v1287_v1 }
 0x738   : > { %2185 = vpow2.f32 %v1170_v2  ;;  %v1302_v2 = vld [vmem:[%s3115_s4 + $0x198] sm:$0xff] }
 0x739   : > { %2187 = vrcp.f32 %v723_v21  ;;  %1814 = vmatprep.subr.mxu1 %v1302_v2 }
 0x745   : > { %v2186_v6 = vpop.eup %2185 }
 0x746   : > { %1172 = vadd.xlane.f32.xlu0 %v2186_v6  ;;  %2103 = vmatmul.mubr.f32.vlgmr.msra.gmra.mxu0 %v2186_v6  ;;  %v2188_v63 = vpop.eup %2187  ;;  %v1300_v6 = vld [vmem:[%s3115_s4 + $0x188] sm:$0xff] }
 0x747   : > { %1756 = vmatpush3.msra.mxu0 %v1266_v4  ;;  %1386 = vmatprep.mubr.f32.mxu0 %v945_v7  ;;  %v795_v61 = vmul.f32 %v2188_v63, %v2705_v25  ;;  %v1286_v25 = vld [vmem:[%s3115_s4 + $0x118] sm:$0xff]  ;;  %v1285_v4 = vld [vmem:[%s3115_s4 + $0x110] sm:$0xff]  ;;  %v1284_v7 = vld [vmem:[%s3115_s4 + $0x108] sm:$0xff] }
 0x748   : > { %1757 = vmatprep.subr.mxu0 %v1281_v0  ;;  %1815 = vmatpush3.msra.mxu1 %v1286_v25  ;;  %v1299_v0 = vld [vmem:[%s3115_s4 + $0x180] sm:$0xff] }
 0x749   : > { %1758 = vmatpush3.msra.mxu0 %v1265_v8  ;;  %1816 = vmatprep.subr.mxu1 %v1301_v3  ;;  %v1283_v8 = vld [vmem:[%s3115_s4 + $0x100] sm:$0xff] }
 0x74a   : > { %1759 = vmatprep.subr.mxu0 %v1280_v9  ;;  %1817 = vmatpush3.msra.mxu1 %v1285_v4  ;;  %v1023_v9 = vpop.xlane.xlu1 %1022 }
 0x74b   : > { %1760 = vmatpush3.msra.mxu0 %v1264_v5  ;;  %1818 = vmatprep.subr.mxu1 %v1300_v6  ;;  %2189 = vrcp.f32 %v1023_v9 }
 0x74c   : > { %1761 = vmatprep.subr.mxu0 %v1279_v10  ;;  %1819 = vmatpush3.msra.mxu1 %v1284_v7 }
 0x74d   : > { %1762 = vmatpush3.msra.mxu0 %v1263_v11  ;;  %1820 = vmatprep.subr.mxu1 %v1299_v0 }
 0x74e   : > { %1763 = vmatprep.subr.mxu0 %v1278_v12  ;;  %1821 = vmatpush3.msra.mxu1 %v1283_v8 }
 0x74f   : > { %1764 = vmatpush3.msra.mxu0 %v1262_v13 }
 0x750   : > { %1765 = vmatprep.subr.mxu0 %v1277_v14 }
 0x751   : > { %1766 = vmatpush3.msra.mxu0 %v1261_v15 }
 0x752   : > { %1767 = vmatprep.subr.mxu0 %v1276_v16 }
 0x753   : > { %1768 = vmatpush3.msra.mxu0 %v1260_v17 }
 0x754   : > { %1769 = vmatprep.subr.mxu0 %v1275_v22 }
 0x755   : > { %1770 = vmatpush3.msra.mxu0 %v1259_v26 }
 0x756   : > { %1771 = vmatprep.subr.mxu0 %v1274_v28 }
 0x757   : > { %1772 = vmatpush3.msra.mxu0 %v1258_v30 }
 0x758   : > { %1773 = vmatprep.subr.mxu0 %v1273_v32  ;;  %v2190_v10 = vpop.eup %2189 }
 0x759   : > { %1774 = vmatpush3.msra.mxu0 %v1257_v34  ;;  %v1095_v15 = vmul.f32 %v2190_v10, %v2849_v48 }
 0x75a   : > { %1775 = vmatprep.subr.mxu0 %v1272_v36 }
 0x75b   : > { %1776 = vmatpush3.msra.mxu0 %v1256_v38 }
 0x75c   : > { %1777 = vmatprep.subr.mxu0 %v1271_v40 }
 0x75d   : > { %1778 = vmatpush3.msra.mxu0 %v1255_v42 }
 0x75e   : > { %1779 = vmatprep.subr.mxu0 %v1270_v44 }
 0x75f   : > { %1780 = vmatpush3.msra.mxu0 %v1254_v47 }
 0x760   : > { %1781 = vmatprep.subr.mxu0 %v1269_v49 }
 0x761   : > { %1782 = vmatpush3.msra.mxu0 %v1253_v51 }
 0x762   : > { %1783 = vmatprep.subr.mxu0 %v1268_v53 }
 0x763   : > { %1784 = vmatpush3.msra.mxu0 %v1252_v55 }
 0x764   : > { %1785 = vmatprep.subr.mxu0 %v1267_v56 }
 0x765   : > { %1786 = vmatpush3.msra.mxu0 %v1251_v58 }
 0x766   : > { %1387 = vmatmul.mubr.f32.vlgmr.msra.gmra.mxu0 %v795_v61 }
 0x7cf   : > { %v1173_v5 = vpop.xlane.xlu0 %1172 }
 0x7d0   : > { %2191 = vrcp.f32 %v1173_v5 }
 0x7dd   : > { %v2192_v11 = vpop.eup %2191 }
 0x806   : > { %v1240_v12 = vpop.f32.mrf.mxu0 }
 0x807   : > { %v1245_v13 = vmul.f32 %v2192_v11, %v1240_v12 }
 0x808   : > { %v2104_v14 = vpop.f32.mrf.mxu0 }
 0x809   : > { %1456 = vmatprep.mubr.f32.mxu1 %v1245_v13 }
 0x80a   : > { %1457 = vmatmul.mubr.f32.vlgmr.msra.gmra.mxu1 %v1095_v15 }
 0x826   : > { %v1787_v16 = vpop.f32.mrf.mxu0 }
 0x828   : > { %v1788_v17 = vpop.f32.mrf.mxu0 }
 0x829   : > { %v1789_v18 = vadd.f32 %v1788_v17, %v1787_v16 }
 0x82b   : > { %v1389_v22 = vadd.f32 %v1789_v18, %v1612_v19 }
 0x8ca   : > { %v1822_v20 = vpop.f32.mrf.mxu1 }
 0x8cc   : > { %v1823_v21 = vpop.f32.mrf.mxu1 }
 0x8cd   : > { %v1824_v23 = vadd.f32 %v1823_v21, %v1822_v20 }
 0x8cf   : > { %v1459_v48 = vadd.f32 %v1824_v23, %v1389_v22 }
 0x8d1   : > { %1462 = vst.msk [vmem:[%s344_s19] sm:$0xff] %vm497_vm0, %v1459_v48 }
 0x8d2   : > { %2262 = shalt.err (!%p2259_p10)
}
 0x8d3   : > { %s2263_s20 = scalar_lea.hbm %s1476_s28, 128  ;;  %s2267_s13 = scalar_lea.hbm %s3117_s6, 256 }
 0x8d4   : > { %p2264_p1 = scmp.ne.s32.totalorder %s1476_s28, %s2263_s20  ;;  %p2268_p0 = scmp.lt.s32.totalorder %s1476_s28, %s3117_s6 }
 0x8d5   : > { %p2269_p8 = scmp.lt.s32.totalorder %s2267_s13, %s2263_s20 }
 0x8d6   : > { %p2265_p13 = pnand %p2264_p1, %p2429_p9 }
 0x8d7   : > { %p2270_p2 = por %p2269_p8, %p2268_p0 }
 0x8d8   : > { %p2266_p3 = pneg %p2265_p13 }
 0x8da   : > { %p2271_p12 = pnand %p2270_p2, %p2266_p3 }
 0x8dc   : > { %2274 = shalt.err (!%p2271_p12)
}
 0x8dd   : > { %2109 = dma.vmem_to_hbm [thread:$0]  (%p2429_p9), %s1479_s8, 128, %s1476_s28, %s1464_s16  }
 0x8de PF: > { %s1490_s27 = sand.u32 1, %s2313_s21   ;;  %p3133_p5 = scmp.ge.s32.totalorder %s2333_s26, 2 }
 0x8df   : > { %s1491_s11 = scalar_lea.sflag [#allocation5], %s1490_s27 }
 0x8e0   : > { %p2119_p6 = pnand %p3133_p5, %p2436_p11 }
 0x8e2   : > { %p2120_p4 = pneg %p2119_p6 }
 0x8e4   : > { %2308 = dma.done.wait (%p2120_p4), %s1491_s11, 128  }
 0x8e5   : > { %2310 = vsyncadd (%p2120_p4), %s1491_s11, 4294967168  ;;  %s25_s26 = sadd.s32 1, %s2333_s26   ;;  %s3134_s17 = sld [smem:[#allocation12_spill]] }
 0x8e6   : > { %p22_p7 = scmp.ge.s32.totalorder %s25_s26, 4   ;;  %s3135_s23 = sld [smem:[#allocation14_spill]] }
 0x8e7   : > { %s3136_s10 = sld [smem:[#allocation13_spill]]  ;;  %s3137_s21 = smov %s2317_s22 }
 0x8e8   : > { %s3139_s24 = smov %s2329_s25 }
 0x8e9   :  { %24 = sbr.rel (!%p22_p7) target bundleno = 10 (0xa), region = 105 }
 0x8eb   : > { %s3138_s22 = smov %s3134_s17 }
 0x8ed   : > { %s3140_s25 = smov %s3136_s10 }
 0x8ee   :  { %1496 = vsyncpa [#allocation4], 1 }
 0x8ef   :  { %1498 = vsyncpa [#allocation4 + $0x1], 1 }
 0x8f0   :  { %1499 = vsyncpa [#allocation7], 1 }
 0x8f1   :  { %1501 = vsyncpa [#allocation7 + $0x1], 1 }
 0x8f2   :  { %1502 = vsyncpa [#allocation5], 1 }
 0x8f3   :  { %1504 = vsyncpa [#allocation5 + $0x1], 1 }

</bundles_post_ra>
